<compile_context>
chip_gen: v5e
topology: v5e:2x2
jax: 0.10.0
libtpu: 0.0.40
codegen_flags: <defaults>
</compile_context>

<pallas_src>
import jax
import jax.numpy as jnp
from jax.experimental import pallas as pl
from jax.experimental.pallas import tpu as pltpu

EPS = 1e-5  # nn.LayerNorm default


def _round_up(n, m):
    return ((n + m - 1) // m) * m


def _itemsize(dt):
    return jnp.dtype(dt).itemsize


def _choose_tb(B, block_b, min_steps=4):
    """Pick a batch tile: multiple of 8, divides the 8-aligned batch, >= min_steps tiles."""
    b_pad = _round_up(max(B, 1), 8)
    cap = max(8, min(_round_up(block_b, 8), b_pad))
    # Prefer enough grid steps that the DMA pipeline / both v7x TensorCores get work.
    if b_pad >= 8 * min_steps:
        cap = min(cap, max(8, (b_pad // min_steps) // 8 * 8))
    # Largest multiple of 8 <= cap that divides b_pad (8 always does, since b_pad % 8 == 0).
    tb = 8
    for t in range(8, cap + 1, 8):
        if b_pad % t == 0:
            tb = t
    return tb, b_pad


def linear_block_kernel(x_ref, wt_ref, b_ref, gamma_ref, beta_ref, o_ref):
    # x_ref: (TB, K) input dtype;  wt_ref: (K, N) bf16, transposed once in the wrapper.
    # Cast the x tile to the matmul dtype in-vreg (VPU) -> fast bf16 MXU path, f32 accum.
    x = x_ref[...].astype(wt_ref.dtype)
    y = jnp.dot(x, wt_ref[...], preferred_element_type=jnp.float32)
    y = y + b_ref[...].astype(jnp.float32)

    # LayerNorm over the (full, untiled) feature dim, in f32.
    # Independent sum / sum-of-squares reductions (overlap on the XLU).
    n = y.shape[-1]
    inv_n = 1.0 / n
    s1 = jnp.sum(y, axis=-1, keepdims=True)
    s2 = jnp.sum(y * y, axis=-1, keepdims=True)
    mean = s1 * inv_n
    var = jnp.maximum(s2 * inv_n - mean * mean, 0.0)
    y = (y - mean) * jax.lax.rsqrt(var + EPS)          # rsqrt -> EUP slot
    y = y * gamma_ref[...].astype(jnp.float32) + beta_ref[...].astype(jnp.float32)

    # ReLU + store (lane-dense / unmasked vst when output_dim is a multiple of 128).
    o_ref[...] = jnp.maximum(y, 0.0).astype(o_ref.dtype)
    # TODO(synk): dropout>0 (training-mode Bernoulli mask via pltpu.prng_seed /
    # prng_random_bits) and the 'bn'/'in' norm variants are not implemented; this
    # kernel covers the norm='ln', activation='relu', dropout=0 configuration.


def linear_block(x, w, b, gamma, beta, *, block_b=128, compute_dtype=jnp.bfloat16,
                 out_dtype=None, min_grid_steps=4):
    """Fused Linear -> LayerNorm -> ReLU.

    x: (B, input_dim); w: (output_dim, input_dim) (PyTorch nn.Linear layout);
    b / gamma / beta: (output_dim,).
    """
    B, K = x.shape
    N, K_w = w.shape
    assert K == K_w, "weight shape must be (output_dim, input_dim)"
    out_dtype = x.dtype if out_dtype is None else out_dtype

    tb, b_pad = _choose_tb(B, block_b, min_grid_steps)
    if b_pad != B:
        # Only for ragged B (not a multiple of 8): pad < 8 rows. Padded rows are
        # per-row-normalized garbage that is sliced off below; they never leak.
        x_in = jnp.zeros((b_pad, K), x.dtype).at[:B].set(x)
    else:
        x_in = x  # no extra HBM pass over x

    # One-time wrapper-side prep (amortized across all batch tiles and calls):
    # transpose to (K, N) so the kernel dot is the plain NN MXU form (no in-kernel
    # transpose risk) and cast to bf16 (fast MXU path, half the resident VMEM).
    wt = w.T.astype(compute_dtype)
    b2 = b.reshape(1, N).astype(jnp.float32)
    g2 = gamma.reshape(1, N).astype(jnp.float32)
    be2 = beta.reshape(1, N).astype(jnp.float32)

    grid = (b_pad // tb,)

    # VMEM budget: double-buffered x/out tiles + (at most double-buffered) params + headroom.
    buf_bytes = (2 * tb * K * _itemsize(x.dtype)
                 + 2 * tb * N * _itemsize(out_dtype)
                 + 2 * K * N * _itemsize(compute_dtype)
                 + 2 * 3 * N * 4)
    assert buf_bytes <= (48 << 20), (
        "weight/tiles too large to stay VMEM-resident; needs a K/N-tiled grid")
    # TODO(synk): for weights too large to stay resident (K*N*2B >~ 16 MiB on v7x),
    # add a K-tiled grid axis with an f32 VMEM accumulator and pl.when init/finalize.
    vmem_limit = int(min(64 << 20, max(buf_bytes + (4 << 20), 8 << 20)))

    def build(single_buffer_params):
        # Constant-index params do not need double buffering; request 1 buffer.
        extra = dict(pipeline_mode=pl.Buffered(1)) if single_buffer_params else {}
        in_specs = [
            # x: tiled along batch only.
            pl.BlockSpec((tb, K), lambda i: (i, 0)),
            # weight + params: constant index_map -> resident in VMEM across steps.
            pl.BlockSpec((K, N), lambda i: (0, 0), **extra),
            pl.BlockSpec((1, N), lambda i: (0, 0), **extra),
            pl.BlockSpec((1, N), lambda i: (0, 0), **extra),
            pl.BlockSpec((1, N), lambda i: (0, 0), **extra),
        ]
        return pl.pallas_call(
            linear_block_kernel,
            out_shape=jax.ShapeDtypeStruct((b_pad, N), out_dtype),
            grid_spec=pltpu.PrefetchScalarGridSpec(
                num_scalar_prefetch=0,
                grid=grid,
                in_specs=in_specs,
                out_specs=pl.BlockSpec((tb, N), lambda i: (i, 0)),
            ),
            compiler_params=pltpu.CompilerParams(
                # Batch tiles are independent -> shard across TensorCores (v7x megacore).
                dimension_semantics=("parallel",),
                vmem_limit_bytes=vmem_limit,
            ),
        )

    try:
        out = build(True)(x_in, wt, b2, g2, be2)
    except Exception:
        # Some jax versions reject Buffered(1) on pallas_call BlockSpecs; the only loss
        # is the halved resident-param VMEM, so fall back to default double buffering.
        out = build(False)(x_in, wt, b2, g2, be2)

    return out[:B] if b_pad != B else out


def reference(x, w, b, gamma, beta, compute_dtype=jnp.bfloat16):
    # Module semantics (Linear -> LayerNorm -> ReLU) with the same bf16-operand /
    # f32-accumulate matmul path the kernel uses.
    y = jnp.dot(x.astype(compute_dtype), w.astype(compute_dtype).T,
                preferred_element_type=jnp.float32) + b
    mean = jnp.mean(y, axis=-1, keepdims=True)
    var = jnp.mean((y - mean) ** 2, axis=-1, keepdims=True)
    y = (y - mean) / jnp.sqrt(var + EPS)
    y = y * gamma + beta
    return jnp.maximum(y, 0.0)


if __name__ == "__main__":
    key = jax.random.PRNGKey(0)
    k_x, k_w, k_b, k_g, k_be = jax.random.split(key, 5)

    # Lane-dense feature dims (multiples of 128); batch tiled into 4 grid steps.
    batch, input_dim, output_dim = 512, 128, 128

    x = jax.random.normal(k_x, (batch, input_dim), dtype=jnp.float32)
    # Parameters in PyTorch layout: nn.Linear(input_dim, output_dim) + LayerNorm(output_dim).
    w = jax.random.normal(k_w, (output_dim, input_dim), dtype=jnp.float32) * 0.1
    b = jax.random.normal(k_b, (output_dim,), dtype=jnp.float32) * 0.1
    gamma = 1.0 + 0.05 * jax.random.normal(k_g, (output_dim,), dtype=jnp.float32)
    beta = 0.05 * jax.random.normal(k_be, (output_dim,), dtype=jnp.float32)

    # block_b=128 -> grid of 4 batch tiles, no host-side padding (512 % 128 == 0).
    out = linear_block(x, w, b, gamma, beta, block_b=128)
    out = jax.block_until_ready(out)

    ref = reference(x, w, b, gamma, beta)
    assert out.shape == (batch, output_dim)
    assert out.dtype == x.dtype
    max_err = float(jnp.max(jnp.abs(out - ref)))
    assert jnp.allclose(out, ref, atol=5e-3, rtol=5e-3), f"mismatch vs reference ({max_err})"

    print("KERNEL_OK")
</pallas_src>

<mosaic_0001>
module attributes {stable_mosaic.version = 11 : i64} {
  func.func @linear_block_kernel(%arg0: i32, %arg1: memref<128x128xf32, #tpu.memory_space<vmem>>, %arg2: memref<128x128xbf16, #tpu.memory_space<vmem>>, %arg3: memref<1x128xf32, #tpu.memory_space<vmem>>, %arg4: memref<1x128xf32, #tpu.memory_space<vmem>>, %arg5: memref<1x128xf32, #tpu.memory_space<vmem>>, %arg6: memref<128x128xf32, #tpu.memory_space<vmem>>) attributes {dimension_semantics = [#tpu.dimension_semantics<parallel>], iteration_bounds = array<i64: 4>, scalar_prefetch = 0 : i64, scratch_operands = 0 : i64, tpu.core_type = #tpu.core_type<tc>, window_params = [{transform_indices = @transform_0, window_bounds = array<i64: 128, 128>}, {pipeline_mode = #tpu.pipeline_mode<synchronous>, transform_indices = @transform_1, window_bounds = array<i64: 128, 128>}, {pipeline_mode = #tpu.pipeline_mode<synchronous>, transform_indices = @transform_2, window_bounds = array<i64: 1, 128>}, {pipeline_mode = #tpu.pipeline_mode<synchronous>, transform_indices = @transform_3, window_bounds = array<i64: 1, 128>}, {pipeline_mode = #tpu.pipeline_mode<synchronous>, transform_indices = @transform_4, window_bounds = array<i64: 1, 128>}, {transform_indices = @transform_5, window_bounds = array<i64: 128, 128>}]} {
    %c0 = arith.constant 0 : index
    %c0_0 = arith.constant 0 : index
    %0 = vector.load %arg1[%c0, %c0_0] : memref<128x128xf32, #tpu.memory_space<vmem>>, vector<128x128xf32>
    %1 = arith.truncf %0 : vector<128x128xf32> to vector<128x128xbf16>
    %c0_1 = arith.constant 0 : index
    %c0_2 = arith.constant 0 : index
    %2 = vector.load %arg2[%c0_1, %c0_2] : memref<128x128xbf16, #tpu.memory_space<vmem>>, vector<128x128xbf16>
    %cst = arith.constant dense<0.000000e+00> : vector<128x128xf32>
    %3 = tpu.matmul %1, %2, %cst {dimension_numbers = #tpu.dot_dimension_numbers<[1], [0], [0], [1], [0, 0, 1, 1], [], []>} : vector<128x128xbf16>, vector<128x128xbf16>, vector<128x128xf32> -> vector<128x128xf32>
    %c0_3 = arith.constant 0 : index
    %c0_4 = arith.constant 0 : index
    %4 = vector.load %arg3[%c0_3, %c0_4] : memref<1x128xf32, #tpu.memory_space<vmem>>, vector<1x128xf32>
    %5 = vector.broadcast %4 : vector<1x128xf32> to vector<128x128xf32>
    %6 = arith.addf %3, %5 : vector<128x128xf32>
    %cst_5 = arith.constant dense<0.000000e+00> : vector<128xf32>
    %7 = vector.multi_reduction <add>, %6, %cst_5 [1] : vector<128x128xf32> to vector<128xf32>
    %8 = vector.shape_cast %7 : vector<128xf32> to vector<128x1xf32>
    %9 = arith.mulf %6, %6 : vector<128x128xf32>
    %cst_6 = arith.constant dense<0.000000e+00> : vector<128xf32>
    %10 = vector.multi_reduction <add>, %9, %cst_6 [1] : vector<128x128xf32> to vector<128xf32>
    %11 = vector.shape_cast %10 : vector<128xf32> to vector<128x1xf32>
    %cst_7 = arith.constant 7.812500e-03 : f32
    %12 = vector.broadcast %cst_7 : f32 to vector<128x1xf32>
    %13 = arith.mulf %8, %12 : vector<128x1xf32>
    %cst_8 = arith.constant 7.812500e-03 : f32
    %14 = vector.broadcast %cst_8 : f32 to vector<128x1xf32>
    %15 = arith.mulf %11, %14 : vector<128x1xf32>
    %16 = arith.mulf %13, %13 : vector<128x1xf32>
    %17 = arith.subf %15, %16 : vector<128x1xf32>
    %cst_9 = arith.constant 0.000000e+00 : f32
    %18 = vector.broadcast %cst_9 : f32 to vector<128x1xf32>
    %19 = arith.maximumf %17, %18 : vector<128x1xf32>
    %20 = vector.broadcast %13 : vector<128x1xf32> to vector<128x128xf32>
    %21 = arith.subf %6, %20 : vector<128x128xf32>
    %cst_10 = arith.constant 9.99999974E-6 : f32
    %22 = vector.broadcast %cst_10 : f32 to vector<128x1xf32>
    %23 = arith.addf %19, %22 : vector<128x1xf32>
    %24 = math.rsqrt %23 : vector<128x1xf32>
    %25 = vector.broadcast %24 : vector<128x1xf32> to vector<128x128xf32>
    %26 = arith.mulf %21, %25 : vector<128x128xf32>
    %c0_11 = arith.constant 0 : index
    %c0_12 = arith.constant 0 : index
    %27 = vector.load %arg4[%c0_11, %c0_12] : memref<1x128xf32, #tpu.memory_space<vmem>>, vector<1x128xf32>
    %28 = vector.broadcast %27 : vector<1x128xf32> to vector<128x128xf32>
    %29 = arith.mulf %26, %28 : vector<128x128xf32>
    %c0_13 = arith.constant 0 : index
    %c0_14 = arith.constant 0 : index
    %30 = vector.load %arg5[%c0_13, %c0_14] : memref<1x128xf32, #tpu.memory_space<vmem>>, vector<1x128xf32>
    %31 = vector.broadcast %30 : vector<1x128xf32> to vector<128x128xf32>
    %32 = arith.addf %29, %31 : vector<128x128xf32>
    %cst_15 = arith.constant 0.000000e+00 : f32
    %33 = vector.broadcast %cst_15 : f32 to vector<128x128xf32>
    %34 = arith.maximumf %32, %33 : vector<128x128xf32>
    %c0_16 = arith.constant 0 : index
    %c0_17 = arith.constant 0 : index
    %35 = vector.load %arg6[%c0_16, %c0_17] : memref<128x128xf32, #tpu.memory_space<vmem>>, vector<128x128xf32>
    tpu.vector_store %arg6[%c0_16, %c0_17], %34 {strides = array<i32>} : memref<128x128xf32, #tpu.memory_space<vmem>>, vector<128x128xf32>,
    return
  }
  func.func @transform_0(%arg0: i32) -> (i32, i32) {
    %c0_i32 = arith.constant 0 : i32
    %c0_i32_0 = arith.constant 0 : i32
    return %arg0, %c0_i32 : i32, i32
  }
  func.func @transform_1(%arg0: i32) -> (i32, i32) {
    %c0_i32 = arith.constant 0 : i32
    %c0_i32_0 = arith.constant 0 : i32
    %c0_i32_1 = arith.constant 0 : i32
    return %c0_i32, %c0_i32_0 : i32, i32
  }
  func.func @transform_2(%arg0: i32) -> (i32, i32) {
    %c0_i32 = arith.constant 0 : i32
    %c0_i32_0 = arith.constant 0 : i32
    %c0_i32_1 = arith.constant 0 : i32
    return %c0_i32, %c0_i32_0 : i32, i32
  }
  func.func @transform_3(%arg0: i32) -> (i32, i32) {
    %c0_i32 = arith.constant 0 : i32
    %c0_i32_0 = arith.constant 0 : i32
    %c0_i32_1 = arith.constant 0 : i32
    return %c0_i32, %c0_i32_0 : i32, i32
  }
  func.func @transform_4(%arg0: i32) -> (i32, i32) {
    %c0_i32 = arith.constant 0 : i32
    %c0_i32_0 = arith.constant 0 : i32
    %c0_i32_1 = arith.constant 0 : i32
    return %c0_i32, %c0_i32_0 : i32, i32
  }
  func.func @transform_5(%arg0: i32) -> (i32, i32) {
    %c0_i32 = arith.constant 0 : i32
    %c0_i32_0 = arith.constant 0 : i32
    return %arg0, %c0_i32 : i32, i32
  }
}

module attributes {stable_mosaic.version = 11 : i64} {
  func.func @linear_block_kernel(%arg0: i32, %arg1: memref<128x128xf32, #tpu.memory_space<vmem>>, %arg2: memref<128x128xbf16, #tpu.memory_space<vmem>>, %arg3: memref<1x128xf32, #tpu.memory_space<vmem>>, %arg4: memref<1x128xf32, #tpu.memory_space<vmem>>, %arg5: memref<1x128xf32, #tpu.memory_space<vmem>>, %arg6: memref<128x128xf32, #tpu.memory_space<vmem>>) attributes {dimension_semantics = [#tpu.dimension_semantics<parallel>], iteration_bounds = array<i64: 4>, scalar_prefetch = 0 : i64, scratch_operands = 0 : i64, tpu.core_type = #tpu.core_type<tc>, window_params = [{transform_indices = @transform_0, window_bounds = array<i64: 128, 128>}, {pipeline_mode = #tpu.pipeline_mode<synchronous>, transform_indices = @transform_1, window_bounds = array<i64: 128, 128>}, {pipeline_mode = #tpu.pipeline_mode<synchronous>, transform_indices = @transform_2, window_bounds = array<i64: 1, 128>}, {pipeline_mode = #tpu.pipeline_mode<synchronous>, transform_indices = @transform_3, window_bounds = array<i64: 1, 128>}, {pipeline_mode = #tpu.pipeline_mode<synchronous>, transform_indices = @transform_4, window_bounds = array<i64: 1, 128>}, {transform_indices = @transform_5, window_bounds = array<i64: 128, 128>}]} {
    %c0 = arith.constant 0 : index
    %c0_0 = arith.constant 0 : index
    %0 = vector.load %arg1[%c0, %c0_0] : memref<128x128xf32, #tpu.memory_space<vmem>>, vector<128x128xf32>
    %1 = arith.truncf %0 : vector<128x128xf32> to vector<128x128xbf16>
    %c0_1 = arith.constant 0 : index
    %c0_2 = arith.constant 0 : index
    %2 = vector.load %arg2[%c0_1, %c0_2] : memref<128x128xbf16, #tpu.memory_space<vmem>>, vector<128x128xbf16>
    %cst = arith.constant dense<0.000000e+00> : vector<128x128xf32>
    %3 = tpu.matmul %1, %2, %cst {dimension_numbers = #tpu.dot_dimension_numbers<[1], [0], [0], [1], [0, 0, 1, 1], [], []>} : vector<128x128xbf16>, vector<128x128xbf16>, vector<128x128xf32> -> vector<128x128xf32>
    %c0_3 = arith.constant 0 : index
    %c0_4 = arith.constant 0 : index
    %4 = vector.load %arg3[%c0_3, %c0_4] : memref<1x128xf32, #tpu.memory_space<vmem>>, vector<1x128xf32>
    %5 = vector.broadcast %4 : vector<1x128xf32> to vector<128x128xf32>
    %6 = arith.addf %3, %5 : vector<128x128xf32>
    %cst_5 = arith.constant dense<0.000000e+00> : vector<128xf32>
    %7 = vector.multi_reduction <add>, %6, %cst_5 [1] : vector<128x128xf32> to vector<128xf32>
    %8 = vector.shape_cast %7 : vector<128xf32> to vector<128x1xf32>
    %9 = arith.mulf %6, %6 : vector<128x128xf32>
    %cst_6 = arith.constant dense<0.000000e+00> : vector<128xf32>
    %10 = vector.multi_reduction <add>, %9, %cst_6 [1] : vector<128x128xf32> to vector<128xf32>
    %11 = vector.shape_cast %10 : vector<128xf32> to vector<128x1xf32>
    %cst_7 = arith.constant 7.812500e-03 : f32
    %12 = vector.broadcast %cst_7 : f32 to vector<128x1xf32>
    %13 = arith.mulf %8, %12 : vector<128x1xf32>
    %cst_8 = arith.constant 7.812500e-03 : f32
    %14 = vector.broadcast %cst_8 : f32 to vector<128x1xf32>
    %15 = arith.mulf %11, %14 : vector<128x1xf32>
    %16 = arith.mulf %13, %13 : vector<128x1xf32>
    %17 = arith.subf %15, %16 : vector<128x1xf32>
    %cst_9 = arith.constant 0.000000e+00 : f32
    %18 = vector.broadcast %cst_9 : f32 to vector<128x1xf32>
    %19 = arith.maximumf %17, %18 : vector<128x1xf32>
    %20 = vector.broadcast %13 : vector<128x1xf32> to vector<128x128xf32>
    %21 = arith.subf %6, %20 : vector<128x128xf32>
    %cst_10 = arith.constant 9.99999974E-6 : f32
    %22 = vector.broadcast %cst_10 : f32 to vector<128x1xf32>
    %23 = arith.addf %19, %22 : vector<128x1xf32>
    %24 = math.rsqrt %23 : vector<128x1xf32>
    %25 = vector.broadcast %24 : vector<128x1xf32> to vector<128x128xf32>
    %26 = arith.mulf %21, %25 : vector<128x128xf32>
    %c0_11 = arith.constant 0 : index
    %c0_12 = arith.constant 0 : index
    %27 = vector.load %arg4[%c0_11, %c0_12] : memref<1x128xf32, #tpu.memory_space<vmem>>, vector<1x128xf32>
    %28 = vector.broadcast %27 : vector<1x128xf32> to vector<128x128xf32>
    %29 = arith.mulf %26, %28 : vector<128x128xf32>
    %c0_13 = arith.constant 0 : index
    %c0_14 = arith.constant 0 : index
    %30 = vector.load %arg5[%c0_13, %c0_14] : memref<1x128xf32, #tpu.memory_space<vmem>>, vector<1x128xf32>
    %31 = vector.broadcast %30 : vector<1x128xf32> to vector<128x128xf32>
    %32 = arith.addf %29, %31 : vector<128x128xf32>
    %cst_15 = arith.constant 0.000000e+00 : f32
    %33 = vector.broadcast %cst_15 : f32 to vector<128x128xf32>
    %34 = arith.maximumf %32, %33 : vector<128x128xf32>
    %c0_16 = arith.constant 0 : index
    %c0_17 = arith.constant 0 : index
    %35 = vector.load %arg6[%c0_16, %c0_17] : memref<128x128xf32, #tpu.memory_space<vmem>>, vector<128x128xf32>
    tpu.vector_store %arg6[%c0_16, %c0_17], %34 {strides = array<i32>} : memref<128x128xf32, #tpu.memory_space<vmem>>, vector<128x128xf32>,
    return
  }
  func.func @transform_0(%arg0: i32) -> (i32, i32) {
    %c0_i32 = arith.constant 0 : i32
    %c0_i32_0 = arith.constant 0 : i32
    return %arg0, %c0_i32 : i32, i32
  }
  func.func @transform_1(%arg0: i32) -> (i32, i32) {
    %c0_i32 = arith.constant 0 : i32
    %c0_i32_0 = arith.constant 0 : i32
    %c0_i32_1 = arith.constant 0 : i32
    return %c0_i32, %c0_i32_0 : i32, i32
  }
  func.func @transform_2(%arg0: i32) -> (i32, i32) {
    %c0_i32 = arith.constant 0 : i32
    %c0_i32_0 = arith.constant 0 : i32
    %c0_i32_1 = arith.constant 0 : i32
    return %c0_i32, %c0_i32_0 : i32, i32
  }
  func.func @transform_3(%arg0: i32) -> (i32, i32) {
    %c0_i32 = arith.constant 0 : i32
    %c0_i32_0 = arith.constant 0 : i32
    %c0_i32_1 = arith.constant 0 : i32
    return %c0_i32, %c0_i32_0 : i32, i32
  }
  func.func @transform_4(%arg0: i32) -> (i32, i32) {
    %c0_i32 = arith.constant 0 : i32
    %c0_i32_0 = arith.constant 0 : i32
    %c0_i32_1 = arith.constant 0 : i32
    return %c0_i32, %c0_i32_0 : i32, i32
  }
  func.func @transform_5(%arg0: i32) -> (i32, i32) {
    %c0_i32 = arith.constant 0 : i32
    %c0_i32_0 = arith.constant 0 : i32
    return %arg0, %c0_i32 : i32, i32
  }
}

</mosaic_0001>

<bundles_post_ra>
// kernel: tpu_custom_call.1
= control target key start
LH: loop header
LB: loop body
LE: loop exit
PB: predicated region body
PF: predicated region fallthrough
CT: control target
= control target key end

     0   :  { %10 = vsyncpa [#allocation3], 0  ;;  %s1787_s0 = inlined_call_operand.hbm [shape: f32[512,128], index: 0, kind: input, shape index: {}]   ;;  %s1788_s1 = inlined_call_operand.hbm [shape: bf16[128,128], index: 1, kind: input, shape index: {}]   ;;  %s1789_s2 = inlined_call_operand.vmem [shape: f32[1,128], index: 2, kind: input, shape index: {}]   ;;  %s1790_s3 = inlined_call_operand.vmem [shape: f32[1,128], index: 3, kind: input, shape index: {}]   ;;  %s1791_s4 = inlined_call_operand.vmem [shape: f32[1,128], index: 4, kind: input, shape index: {}]   ;;  %s1792_s5 = inlined_call_operand.hbm [shape: f32[512,128], index: 5, kind: output, shape index: {}]  }
   0x1   :  { %12 = vsyncpa [#allocation3 + $0x1], 0 }
   0x2   :  { %13 = vsyncpa [#allocation6], 0 }
   0x3   :  { %14 = vsyncpa [#allocation4], 0 }
   0x4   :  { %16 = vsyncpa [#allocation4 + $0x1], 0  ;;  %s1293_s18 = smov 0   ;;  %s1295_s19 = smov 0  }
   0x5   :  { %s1297_s20 = smov 0   ;;  %s1299_s21 = smov 0  }
   0x6 LB: > { %s1314_s22 = sadd.s32 4294967295, %s1254_s21   ;;  %s944_s23 = sadd.s32 4294967294, %s1254_s21   ;;  %s1254_s21 = sphi %s1299_s21, %s1801_s21   ;;  %s1250_s20 = sphi %s1297_s20, %s1800_s20   ;;  %s1246_s19 = sphi %s1295_s19, %s1799_s19   ;;  %s1242_s18 = sphi %s1293_s18, %s1798_s18  }
   0x7   : > { %p42_p0 = scmp.ne.s32.totalorder %s1246_s19, %s1242_s18  ;;  %p43_p1 = scmp.eq.s32.totalorder %s1314_s22, 0 }
   0x8   : > { %p150_p2 = scmp.eq.s32.totalorder %s1314_s22, 3  ;;  %p156_p3 = scmp.eq.s32.totalorder %s944_s23, 3 }
   0x9   : > { %p1323_p4 = por %p43_p1, %p42_p0  ;;  %p945_p5 = scmp.ge.s32.totalorder %s1254_s21, 1 }
   0xa   : > { %p1328_p6 = por %p156_p3, %p42_p0  ;;  %p163_p7 = scmp.lt.s32.totalorder %s1254_s21, 5 }
   0xb   : > { %s174_s28 = sshll.u32 %s1788_s1, 4  ;;  %s1256_s30 = smov [#allocation5]   ;;  %s175_s28 = int_to_ptr.hbm [resolvable:$true] %s174_s28 }
   0xc   : > { %p1336_p8 = pnand %p945_p5, %p163_p7  ;;  %s176_s6 = sshll.u32 %s1256_s30, 4  ;;  %s177_s6 = int_to_ptr.vmem [resolvable:$true] %s176_s6 }
   0xd   : > { %s1345_s7 = sadd.s32 1, %s1254_s21   ;;  %s1257_s8 = smov 64  }
   0xe   : > { %p1034_p9 = pneg %p1336_p8  ;;  %s1258_s9 = smov 4  }
   0xf   : > { %s26_s10 = ssub.s32 %s1254_s21, %s1345_s7  ;;  %s29_s11 = sadd.s32 1, %s1250_s20 }
  0x10   : > { %p1035_p10 = pnand %p1034_p9, %p43_p1  ;;  %p27_p11 = scmp.eq.s32.totalorder %s26_s10, 0 }
  0x11   : > { %p36_p12 = scmp.ne.s32.totalorder %s1250_s20, %s1246_s19  ;;  %p37_p13 = scmp.eq.s32.totalorder %s1254_s21, 0 }
  0x12   : > { %1037 = dma.hbm_to_vmem [thread:$0]  (!%p1035_p10), %s175_s28, 1024, %s177_s6, [#allocation6], %s1257_s8, %s1257_s8, %s1258_s9  }
  0x13   : > { %p1047_p0 = scmp.lt.s32.totalorder %s1254_s21, 4  ;;  %p38_p3 = por %p37_p13, %p36_p12 }
  0x14   : > { %s1355_s12 = scalar_select %p27_p11, %s1250_s20, %s29_s11  }
  0x15   : > { %p1359_p5 = por %p150_p2, %p36_p12  ;;  %s199_s14 = sand.u32 1, %s1250_s20  }
  0x16   : > { %s992_s15 = sshll.u32 %s1254_s21, 7  ;;  %s948_s16 = sshll.u32 %s199_s14, 7 }
  0x17   : > { %s208_s26 = scalar_lea.hbm %s1787_s0, %s992_s15  ;;  %s203_s28 = scalar_lea.vmem [#allocation2], %s948_s16 }
  0x18   : > { %s209_s27 = sshll.u32 %s208_s26, 4  ;;  %s211_s30 = sshll.u32 %s203_s28, 4  ;;  %s210_s27 = int_to_ptr.hbm [resolvable:$true] %s209_s27  ;;  %s212_s30 = int_to_ptr.vmem [resolvable:$true] %s211_s30 }
  0x19   : > { %p1370_p7 = pnand %p1047_p0, %p38_p3  ;;  %s200_s8 = scalar_lea.sflag [#allocation3], %s199_s14 }
  0x1a   : > { %s1154_s9 = sshra.s32 %s210_s27, 4  ;;  %s1161_s16 = scalar_lea.hbm %s1787_s0, 512  ;;  %s1155_s9 = int_to_ptr.hbm [resolvable:$true] %s1154_s9 }
  0x1b   : > { %s1156_s10 = scalar_lea.hbm %s1155_s9, 128  ;;  %p1158_p9 = pneg %p1370_p7 }
  0x1c   : > { %p1157_p2 = scmp.ne.s32.totalorder %s1155_s9, %s1156_s10  ;;  %p1162_p12 = scmp.lt.s32.totalorder %s1155_s9, %s1787_s0 }
  0x1d   : > { %p1163_p13 = scmp.lt.s32.totalorder %s1161_s16, %s1156_s10 }
  0x1e   : > { %p1159_p10 = pnand %p1158_p9, %p1157_p2 }
  0x1f   : > { %p1164_p0 = por %p1163_p13, %p1162_p12 }
  0x20   : > { %p1160_p11 = pneg %p1159_p10 }
  0x22   : > { %p1165_p3 = pnand %p1164_p0, %p1160_p11 }
  0x24   : > { %1168 = shalt.err (!%p1165_p3)
}
  0x25   : > { %s1259_s14 = smov 128   ;;  %s1260_s26 = smov 8  }
  0x26   : > { %1041 = dma.hbm_to_vmem [thread:$0]  (!%p1370_p7), %s210_s27, 2048, %s212_s30, %s200_s8, %s1259_s14, %s1259_s14, %s1260_s26  }
  0x27   : > { %223 = sbr.rel (%p1336_p8) target bundleno = 443 (0x1bb), region = 40  ;;  %s1387_s28 = sand.u32 (!%p1336_p8), 1, %s1246_s19  }
  0x28   : > { %s952_s9 = sshll.u32 (!%p1336_p8), %s1387_s28, 7  ;;  %s226_s10 = scalar_lea.sflag (!%p1336_p8), [#allocation3], %s1387_s28 }
  0x29   : > { %s1393_s11 = scalar_lea.vmem (!%p1336_p8), [#allocation2], %s952_s9 }
  0x2c   : > { %1229 = dma.done.wait (%p1323_p4), %s226_s10, 2048  }
  0x2d   : > { %1231 = vsyncadd (%p1323_p4), %s226_s10, 4294965248 }
  0x2e   : > { %1233 = dma.done.wait (%p43_p1), [#allocation6], 1024  }
  0x2f   : > { %1235 = vsyncadd (%p43_p1), [#allocation6], 4294966272  ;;  %v1000_v0 = vld [vmem:[#allocation5 + $0x38] sm:$0xff]  ;;  %v999_v1 = vld [vmem:[#allocation5 + $0x30] sm:$0xff]  ;;  %s1565_s15 = scalar_lea.vmem [#allocation7], %s952_s9  ;;  %s1001_s16 = sshll.u32 %s1314_s22, 7 }
  0x30   : > { %356 = vmatpush.bf16.msra.mxu0 %v1000_v0  ;;  %1002 = vmatpush.bf16.msra.mxu1 %v1000_v0  ;;  %v998_v2 = vld [vmem:[#allocation5 + $0x28] sm:$0xff]  ;;  %v997_v3 = vld [vmem:[#allocation5 + $0x20] sm:$0xff]  ;;  %v996_v4 = vld [vmem:[#allocation5 + $0x18] sm:$0xff]  ;;  %s857_s14 = scalar_lea.hbm %s1792_s5, %s1001_s16  ;;  %s858_s22 = sshll.u32 %s1565_s15, 4  ;;  %s859_s22 = int_to_ptr.vmem [resolvable:$true] %s858_s22 }
  0x31   : > { %1004 = vmatpush.bf16.msra.mxu3 %v1000_v0  ;;  %1003 = vmatpush.bf16.msra.mxu2 %v1000_v0  ;;  %v995_v5 = vld [vmem:[#allocation5 + $0x10] sm:$0xff]  ;;  %v994_v6 = vld [vmem:[#allocation5 + $0x8] sm:$0xff]  ;;  %v993_v7 = vld [vmem:[#allocation5] sm:$0xff]  ;;  %s860_s26 = sshll.u32 %s857_s14, 4  ;;  %s846_s9 = scalar_lea.sflag [#allocation4], %s1387_s28  ;;  %s861_s26 = int_to_ptr.hbm [resolvable:$true] %s860_s26 }
  0x32   : > { %v264_v8 = vld [vmem:[%s1393_s11] sm:$0xff]  ;;  %v265_v9 = vld [vmem:[%s1393_s11 + $0x8] sm:$0xff]  ;;  %v266_v20 = vld [vmem:[%s1393_s11 + $0x10] sm:$0xff]  ;;  %s1198_s10 = sshra.s32 %s861_s26, 4  ;;  %s1204_s27 = scalar_lea.hbm %s1792_s5, 512  ;;  %s1199_s10 = int_to_ptr.hbm [resolvable:$true] %s1198_s10 }
  0x33   : > { %v268_v10 = vld [vmem:[%s1393_s11 + $0x20] sm:$0xff]  ;;  %v269_v11 = vld [vmem:[%s1393_s11 + $0x28] sm:$0xff]  ;;  %v280_v16 = vpack.c.bf16 %v265_v9, %v264_v8  ;;  %v267_v21 = vld [vmem:[%s1393_s11 + $0x18] sm:$0xff]  ;;  %p1205_p7 = scmp.lt.s32.totalorder %s1199_s10, %s1792_s5 }
  0x34   : > { %357 = vmatpush.bf16.msra.mxu0 %v999_v1  ;;  %1005 = vmatpush.bf16.msra.mxu1 %v999_v1  ;;  %v276_v12 = vld [vmem:[%s1393_s11 + $0x60] sm:$0xff]  ;;  %v277_v13 = vld [vmem:[%s1393_s11 + $0x68] sm:$0xff]  ;;  %v282_v17 = vpack.c.bf16 %v269_v11, %v268_v10  ;;  %v270_v22 = vld [vmem:[%s1393_s11 + $0x30] sm:$0xff]  ;;  %v281_v28 = vpack.c.bf16 %v267_v21, %v266_v20 }
  0x35   : > { %1007 = vmatpush.bf16.msra.mxu3 %v999_v1  ;;  %1006 = vmatpush.bf16.msra.mxu2 %v999_v1  ;;  %v272_v14 = vld [vmem:[%s1393_s11 + $0x40] sm:$0xff]  ;;  %v273_v15 = vld [vmem:[%s1393_s11 + $0x48] sm:$0xff]  ;;  %v286_v18 = vpack.c.bf16 %v277_v13, %v276_v12  ;;  %v271_v23 = vld [vmem:[%s1393_s11 + $0x38] sm:$0xff] }
  0x36   : > { %v284_v19 = vpack.c.bf16 %v273_v15, %v272_v14  ;;  %v278_v24 = vld [vmem:[%s1393_s11 + $0x70] sm:$0xff]  ;;  %v279_v25 = vld [vmem:[%s1393_s11 + $0x78] sm:$0xff]  ;;  %v283_v29 = vpack.c.bf16 %v271_v23, %v270_v22  ;;  %v1422_v32 = vld [vmem:[%s1789_s2] ss:$0 sm:$0xff] }
  0x37   : > { %v274_v26 = vld [vmem:[%s1393_s11 + $0x50] sm:$0xff]  ;;  %v275_v27 = vld [vmem:[%s1393_s11 + $0x58] sm:$0xff]  ;;  %v287_v30 = vpack.c.bf16 %v279_v25, %v278_v24  ;;  %s1200_s11 = scalar_lea.hbm %s1199_s10, 128 }
  0x38   : > { %358 = vmatpush.bf16.msra.mxu0 %v998_v2  ;;  %1008 = vmatpush.bf16.msra.mxu1 %v998_v2  ;;  %v285_v31 = vpack.c.bf16 %v275_v27, %v274_v26  ;;  %p1201_p1 = scmp.ne.s32.totalorder %s1199_s10, %s1200_s11  ;;  %p1206_p2 = scmp.lt.s32.totalorder %s1204_s27, %s1200_s11 }
  0x39   : > { %1010 = vmatpush.bf16.msra.mxu3 %v998_v2  ;;  %1009 = vmatpush.bf16.msra.mxu2 %v998_v2 }
  0x3a   : > { %p1202_p4 = pnand %p1201_p1, %p1359_p5  ;;  %p1207_p9 = por %p1206_p2, %p1205_p7 }
  0x3c   : > { %359 = vmatpush.bf16.msra.mxu0 %v997_v3  ;;  %1011 = vmatpush.bf16.msra.mxu1 %v997_v3  ;;  %p1203_p8 = pneg %p1202_p4 }
  0x3d   : > { %1013 = vmatpush.bf16.msra.mxu3 %v997_v3  ;;  %1012 = vmatpush.bf16.msra.mxu2 %v997_v3 }
  0x3e   : > { %p1208_p10 = pnand %p1207_p9, %p1203_p8 }
  0x40   : > { %360 = vmatpush.bf16.msra.mxu0 %v996_v4  ;;  %1014 = vmatpush.bf16.msra.mxu1 %v996_v4 }
  0x41   : > { %1016 = vmatpush.bf16.msra.mxu3 %v996_v4  ;;  %1015 = vmatpush.bf16.msra.mxu2 %v996_v4 }
  0x44   : > { %361 = vmatpush.bf16.msra.mxu0 %v995_v5  ;;  %1017 = vmatpush.bf16.msra.mxu1 %v995_v5 }
  0x45   : > { %1019 = vmatpush.bf16.msra.mxu3 %v995_v5  ;;  %1018 = vmatpush.bf16.msra.mxu2 %v995_v5 }
  0x48   : > { %362 = vmatpush.bf16.msra.mxu0 %v994_v6  ;;  %1020 = vmatpush.bf16.msra.mxu1 %v994_v6 }
  0x49   : > { %1022 = vmatpush.bf16.msra.mxu3 %v994_v6  ;;  %1021 = vmatpush.bf16.msra.mxu2 %v994_v6 }
  0x4c   : > { %363 = vmatpush.bf16.msra.mxu0 %v993_v7  ;;  %1023 = vmatpush.bf16.msra.mxu1 %v993_v7 }
  0x4d   : > { %1025 = vmatpush.bf16.msra.mxu3 %v993_v7  ;;  %1024 = vmatpush.bf16.msra.mxu2 %v993_v7 }
  0x4f   : > { %364 = vmatmul.bf16.vlgmr.msra.gmra.mxu0 %v280_v16  ;;  %374 = vmatmul.bf16.vlgmr.msra.gmra.mxu1 %v282_v17 }
  0x50   : > { %394 = vmatmul.bf16.vlgmr.msra.gmra.mxu3 %v286_v18  ;;  %384 = vmatmul.bf16.vlgmr.msra.gmra.mxu2 %v284_v19 }
  0x5f   : > { %369 = vmatmul.bf16.gmra.mxu0 %v281_v28  ;;  %379 = vmatmul.bf16.gmra.mxu1 %v283_v29 }
  0x60   : > { %399 = vmatmul.bf16.gmra.mxu3 %v287_v30  ;;  %389 = vmatmul.bf16.gmra.mxu2 %v285_v31 }
  0xcc   : > { %v365_v33 = vpop.f32.mrf.mxu0  ;;  %v375_v34 = vpop.f32.mrf.mxu1 }
  0xcd   : > { %v1425_v35 = vadd.f32 %v1422_v32, %v365_v33  ;;  %v1428_v36 = vadd.f32 %v1422_v32, %v375_v34 }
  0xcf   : > { %413 = vadd.xlane.f32.xlu2 %v1428_v36  ;;  %405 = vadd.xlane.f32.xlu0 %v1425_v35  ;;  %v437_v37 = vmul.f32 %v1425_v35, %v1425_v35  ;;  %v441_v39 = vmul.f32 %v1428_v36, %v1428_v36 }
  0xd1   : > { %453 = vadd.xlane.f32.xlu1 %v437_v37 }
  0xd3   : > { %v395_v38 = vpop.f32.mrf.mxu3  ;;  %v385_v42 = vpop.f32.mrf.mxu2 }
  0xd4   : > { %v1437_v40 = vadd.f32 %v1422_v32, %v395_v38  ;;  %v367_v43 = vpop.f32.mrf.mxu0  ;;  %v1443_v44 = vadd.f32 %v1422_v32, %v385_v42  ;;  %v377_v48 = vpop.f32.mrf.mxu1 }
  0xd5   : > { %v1446_v46 = vadd.f32 %v1422_v32, %v367_v43  ;;  %v1457_v51 = vadd.f32 %v1422_v32, %v377_v48 }
  0xd6   : > { %v449_v41 = vmul.f32 %v1437_v40, %v1437_v40  ;;  %v445_v49 = vmul.f32 %v1443_v44, %v1443_v44 }
  0xd7   : > { %461 = vadd.xlane.f32.xlu2 %v441_v39  ;;  %429 = vadd.xlane.f32.xlu0 %v1437_v40  ;;  %v438_v55 = vmul.f32 %v1446_v46, %v1446_v46  ;;  %v442_v56 = vmul.f32 %v1457_v51, %v1457_v51 }
  0xd9   : > { %477 = vadd.xlane.f32.xlu1 %v449_v41 }
  0xdb   : > { %v397_v45 = vpop.f32.mrf.mxu3  ;;  %v387_v53 = vpop.f32.mrf.mxu2 }
  0xdc   : > { %v1449_v47 = vadd.f32 %v1422_v32, %v397_v45  ;;  %v370_v50 = vpop.f32.mrf.mxu0  ;;  %v1465_v54 = vadd.f32 %v1422_v32, %v387_v53  ;;  %v380_v58 = vpop.f32.mrf.mxu1 }
  0xdd   : > { %v1460_v52 = vadd.f32 %v1422_v32, %v370_v50  ;;  %v1474_v60 = vadd.f32 %v1422_v32, %v380_v58 }
  0xde   : > { %v446_v57 = vmul.f32 %v1465_v54, %v1465_v54  ;;  %v450_v12 = vmul.f32 %v1449_v47, %v1449_v47 }
  0xdf   : > { %421 = vadd.xlane.f32.xlu2 %v1443_v44  ;;  %407 = vadd.xlane.f32.xlu0 %v1446_v46  ;;  %v443_v62 = vmul.f32 %v1474_v60, %v1474_v60  ;;  %v439_v6 = vmul.f32 %v1460_v52, %v1460_v52 }
  0xe1   : > { %431 = vadd.xlane.f32.xlu1 %v1449_v47 }
  0xe3   : > { %v400_v59 = vpop.f32.mrf.mxu3  ;;  %v390_v63 = vpop.f32.mrf.mxu2 }
  0xe4   : > { %v1477_v61 = vadd.f32 %v1422_v32, %v400_v59  ;;  %v1482_v0 = vadd.f32 %v1422_v32, %v390_v63  ;;  %v382_v2 = vpop.f32.mrf.mxu1  ;;  %v372_v4 = vpop.f32.mrf.mxu0 }
  0xe5   : > { %v1490_v3 = vadd.f32 %v1422_v32, %v382_v2  ;;  %v1498_v7 = vadd.f32 %v1422_v32, %v372_v4 }
  0xe6   : > { %v447_v1 = vmul.f32 %v1482_v0, %v1482_v0  ;;  %v451_v15 = vmul.f32 %v1477_v61, %v1477_v61 }
  0xe7   : > { %415 = vadd.xlane.f32.xlu2 %v1457_v51  ;;  %469 = vadd.xlane.f32.xlu0 %v445_v49  ;;  %v444_v5 = vmul.f32 %v1490_v3, %v1490_v3  ;;  %v440_v14 = vmul.f32 %v1498_v7, %v1498_v7 }
  0xe9   : > { %409 = vadd.xlane.f32.xlu1 %v1460_v52 }
  0xeb   : > { %v392_v8 = vpop.f32.mrf.mxu2  ;;  %v402_v9 = vpop.f32.mrf.mxu3 }
  0xec   : > { %v1502_v10 = vadd.f32 %v1422_v32, %v392_v8  ;;  %v1505_v11 = vadd.f32 %v1422_v32, %v402_v9 }
  0xee   : > { %v448_v13 = vmul.f32 %v1502_v10, %v1502_v10  ;;  %v452_v16 = vmul.f32 %v1505_v11, %v1505_v11 }
  0xef   : > { %455 = vadd.xlane.f32.xlu2 %v438_v55  ;;  %463 = vadd.xlane.f32.xlu0 %v442_v56 }
  0xf1   : > { %471 = vadd.xlane.f32.xlu1 %v446_v57 }
  0xf7   : > { %433 = vadd.xlane.f32.xlu2 %v1477_v61  ;;  %423 = vadd.xlane.f32.xlu0 %v1465_v54 }
  0xf9   : > { %465 = vadd.xlane.f32.xlu1 %v443_v62 }
  0xff   : > { %473 = vadd.xlane.f32.xlu2 %v447_v1  ;;  %417 = vadd.xlane.f32.xlu0 %v1474_v60 }
 0x101   : > { %425 = vadd.xlane.f32.xlu1 %v1482_v0 }
 0x107   : > { %467 = vadd.xlane.f32.xlu2 %v444_v5  ;;  %457 = vadd.xlane.f32.xlu0 %v439_v6 }
 0x109   : > { %411 = vadd.xlane.f32.xlu1 %v1498_v7 }
 0x10f   : > { %427 = vadd.xlane.f32.xlu2 %v1502_v10  ;;  %435 = vadd.xlane.f32.xlu0 %v1505_v11 }
 0x111   : > { %419 = vadd.xlane.f32.xlu1 %v1490_v3 }
 0x117   : > { %479 = vadd.xlane.f32.xlu2 %v450_v12  ;;  %475 = vadd.xlane.f32.xlu0 %v448_v13 }
 0x119   : > { %459 = vadd.xlane.f32.xlu1 %v440_v14 }
 0x11f   : > { %481 = vadd.xlane.f32.xlu0 %v451_v15 }
 0x121   : > { %483 = vadd.xlane.f32.xlu1 %v452_v16  ;;  %v1542_v16 = vld [vmem:[%s1790_s3] ss:$0 sm:$0xff] }
 0x142   : > { %v414_v17 = vpop.xlane.xlu2 %413  ;;  %v406_v18 = vpop.xlane.xlu0 %405 }
 0x143   : > { %v485_v19 = vmul.f32 0.0078125, %v406_v18  ;;  %v1520_v23 = vmul.f32 0.0078125, %v414_v17 }
 0x144   : > { %v454_v20 = vpop.xlane.xlu1 %453 }
 0x145   : > { %v517_v21 = vmul.f32 %v485_v19, %v485_v19  ;;  %v501_v22 = vmul.f32 0.0078125, %v454_v20  ;;  %v521_v25 = vmul.f32 %v1520_v23, %v1520_v23  ;;  %v565_v15 = vsub.f32 %v1425_v35, %v485_v19 }
 0x146   : > { %v569_v19 = vsub.f32 %v1428_v36, %v1520_v23 }
 0x147   : > { %v533_v24 = vsub.f32 %v501_v22, %v517_v21 }
 0x149   : > { %v549_v26 = vmax.f32 %v533_v24, 0.0  ;;  %v1549_v24 = vld [vmem:[%s1791_s4] ss:$0 sm:$0xff] }
 0x14a   : > { %v462_v27 = vpop.xlane.xlu2 %461  ;;  %v430_v28 = vpop.xlane.xlu0 %429 }
 0x14b   : > { %v505_v29 = vmul.f32 0.0078125, %v462_v27  ;;  %v1524_v30 = vmul.f32 0.0078125, %v430_v28  ;;  %v581_v31 = vadd.f32 1e-05, %v549_v26 }
 0x14c   : > { %v478_v32 = vpop.xlane.xlu1 %477 }
 0x14d   : > { %v537_v33 = vsub.f32 %v505_v29, %v521_v25  ;;  %v529_v34 = vmul.f32 %v1524_v30, %v1524_v30  ;;  %v513_v37 = vmul.f32 0.0078125, %v478_v32  ;;  %1092 = vrsqrt.f32 %v581_v31 }
 0x14e   : > { %vm603_vm1 = vweird.f32 %v581_v31 }
 0x14f   : > { %v553_v38 = vmax.f32 %v537_v33, 0.0  ;;  %v545_v39 = vsub.f32 %v513_v37, %v529_v34 }
 0x151   : > { %v585_v41 = vadd.f32 1e-05, %v553_v38  ;;  %v561_v42 = vmax.f32 %v545_v39, 0.0 }
 0x152   : > { %v422_v43 = vpop.xlane.xlu2 %421  ;;  %v408_v45 = vpop.xlane.xlu0 %407 }
 0x153   : > { %1094 = vrsqrt.f32 %v585_v41  ;;  %v593_v48 = vadd.f32 1e-05, %v561_v42  ;;  %v1093_v49 = vpop.eup %1092  ;;  %v1530_v56 = vmul.f32 0.0078125, %v422_v43  ;;  %v1536_v13 = vmul.f32 0.0078125, %v408_v45 }
 0x154   : > { %v1528_v50 = vpop.xlane.xlu1 %431  ;;  %v598_v53 = vmul.f32 %v1093_v49, %v581_v31  ;;  %vm604_vm0 = vweird.f32 %v1093_v49  ;;  %vm643_vm4 = vweird.f32 %v585_v41  ;;  %v577_v45 = vsub.f32 %v1437_v40, %v1524_v30 }
 0x155   : > { %1096 = vrsqrt.f32 %v593_v48  ;;  %v525_v59 = vmul.f32 %v1530_v56, %v1530_v56  ;;  %vm605_vm2 = vmor %vm603_vm1, %vm604_vm0  ;;  %v518_v27 = vmul.f32 %v1536_v13, %v1536_v13  ;;  %vm723_vm7 = vweird.f32 %v593_v48 }
 0x156   : > { %v599_v55 = vmul.f32 %v1093_v49, %v598_v53 }
 0x158   : > { %v600_v58 = vmul.f32 0.5, %v599_v55 }
 0x159   : > { %v1095_v57 = vpop.eup %1094 }
 0x15a   : > { %v638_v62 = vmul.f32 %v1095_v57, %v585_v41  ;;  %v416_v63 = vpop.xlane.xlu2 %415  ;;  %v470_v1 = vpop.xlane.xlu0 %469  ;;  %v601_v4 = vsub.f32 1.5, %v600_v58  ;;  %vm644_vm3 = vweird.f32 %v1095_v57 }
 0x15b   : > { %v1097_v2 = vpop.eup %1096  ;;  %v509_v5 = vmul.f32 0.0078125, %v470_v1  ;;  %v1544_v21 = vmul.f32 0.0078125, %v416_v63  ;;  %vm645_vm6 = vmor %vm643_vm4, %vm644_vm3 }
 0x15c   : > { %v639_v6 = vmul.f32 %v1095_v57, %v638_v62  ;;  %v718_v8 = vmul.f32 %v1097_v2, %v593_v48  ;;  %v1534_v9 = vpop.xlane.xlu1 %409  ;;  %v602_v12 = vmul.f32 %v1093_v49, %v601_v4  ;;  %vm724_vm5 = vweird.f32 %v1097_v2 }
 0x15d   : > { %v541_v14 = vsub.f32 %v509_v5, %v525_v59  ;;  %v522_v37 = vmul.f32 %v1544_v21, %v1544_v21  ;;  %vm725_vm8 = vmor %vm723_vm7, %vm724_vm5 }
 0x15e   : > { %v640_v17 = vmul.f32 0.5, %v639_v6  ;;  %v719_v18 = vmul.f32 %v1097_v2, %v718_v8  ;;  %v606_v20 = vsel %vm605_vm2, %v1093_v49, %v602_v12 }
 0x15f   : > { %v557_v22 = vmax.f32 %v541_v14, 0.0  ;;  %v757_v25 = vmul.f32 %v606_v20, %v565_v15 }
 0x160   : > { %v641_v26 = vsub.f32 1.5, %v640_v17  ;;  %v720_v35 = vmul.f32 0.5, %v719_v18 }
 0x161   : > { %v589_v28 = vadd.f32 1e-05, %v557_v22  ;;  %v777_v29 = vmul.f32 %v1542_v16, %v757_v25 }
 0x162   : > { %v642_v31 = vmul.f32 %v1095_v57, %v641_v26  ;;  %v721_v32 = vsub.f32 1.5, %v720_v35  ;;  %v456_v33 = vpop.xlane.xlu2 %455  ;;  %v464_v34 = vpop.xlane.xlu0 %463 }
 0x163   : > { %1098 = vrsqrt.f32 %v589_v28  ;;  %v502_v38 = vmul.f32 0.0078125, %v456_v33  ;;  %v506_v39 = vmul.f32 0.0078125, %v464_v34  ;;  %v797_v36 = vadd.f32 %v1549_v24, %v777_v29 }
 0x164   : > { %v646_v23 = vsel %vm645_vm6, %v1095_v57, %v642_v31  ;;  %v722_v41 = vmul.f32 %v1097_v2, %v721_v32  ;;  %v472_v42 = vpop.xlane.xlu1 %471  ;;  %vm683_vm10 = vweird.f32 %v589_v28  ;;  %v573_v34 = vsub.f32 %v1443_v44, %v1530_v56 }
 0x165   : > { %v761_v43 = vmul.f32 %v646_v23, %v569_v19  ;;  %v534_v49 = vsub.f32 %v502_v38, %v518_v27  ;;  %v538_v53 = vsub.f32 %v506_v39, %v522_v37  ;;  %v813_v55 = vmax.f32 %v797_v36, 0.0 }
 0x166   : > { %v726_v58 = vsel %vm725_vm8, %v1097_v2, %v722_v41  ;;  %v510_v22 = vmul.f32 0.0078125, %v472_v42  ;;  %v1590_v36 = vmul.f32 0.0078125, %v1534_v9  ;;  %v566_v9 = vsub.f32 %v1446_v46, %v1536_v13 }
 0x167   : > { %v781_v59 = vmul.f32 %v1542_v16, %v761_v43  ;;  %v769_v62 = vmul.f32 %v726_v58, %v577_v45  ;;  %v550_v63 = vmax.f32 %v534_v49, 0.0  ;;  %v554_v1 = vmax.f32 %v538_v53, 0.0  ;;  %829 = vst [vmem:[%s1565_s15] sm:$0xff] %v813_v55 }
 0x169   : > { %v1099_v48 = vpop.eup %1098  ;;  %v801_v40 = vadd.f32 %v1549_v24, %v781_v59  ;;  %v789_v30 = vmul.f32 %v1542_v16, %v769_v62  ;;  %v1570_v57 = vadd.f32 1e-05, %v550_v63  ;;  %v1572_v2 = vadd.f32 1e-05, %v554_v1 }
 0x16a   : > { %v678_v4 = vmul.f32 %v1099_v48, %v589_v28  ;;  %v1574_v5 = vpop.xlane.xlu2 %433  ;;  %v424_v6 = vpop.xlane.xlu0 %423  ;;  %vm684_vm9 = vweird.f32 %v1099_v48 }
 0x16b   : > { %v817_v8 = vmax.f32 %v801_v40, 0.0  ;;  %v809_v12 = vadd.f32 %v1549_v24, %v789_v30  ;;  %1100 = vrsqrt.f32 %v1570_v57  ;;  %v1580_v18 = vmul.f32 0.0078125, %v424_v6  ;;  %vm685_vm11 = vmor %vm683_vm10, %vm684_vm9 }
 0x16c   : > { %v679_v14 = vmul.f32 %v1099_v48, %v678_v4  ;;  %1102 = vrsqrt.f32 %v1572_v2  ;;  %v466_v15 = vpop.xlane.xlu1 %465  ;;  %v519_v40 = vmul.f32 %v1590_v36, %v1590_v36  ;;  %vm613_vm14 = vweird.f32 %v1570_v57 }
 0x16d   : > { %833 = vst [vmem:[%s1565_s15 + $0x20] sm:$0xff] %v817_v8  ;;  %v825_v17 = vmax.f32 %v809_v12, 0.0  ;;  %v526_v25 = vmul.f32 %v1580_v18, %v1580_v18  ;;  %v507_v44 = vmul.f32 0.0078125, %v466_v15  ;;  %vm653_vm0 = vweird.f32 %v1572_v2 }
 0x16e   : > { %v680_v20 = vmul.f32 0.5, %v679_v14 }
 0x16f   : > { %841 = vst [vmem:[%s1565_s15 + $0x60] sm:$0xff] %v825_v17  ;;  %v542_v19 = vsub.f32 %v510_v22, %v526_v25  ;;  %v570_v17 = vsub.f32 %v1457_v51, %v1544_v21  ;;  %v1622_v21 = vmul.f32 0.0078125, %v1528_v50 }
 0x170   : > { %v681_v26 = vsub.f32 1.5, %v680_v20 }
 0x171   : > { %v1101_v35 = vpop.eup %1100  ;;  %v558_v38 = vmax.f32 %v542_v19, 0.0 }
 0x172   : > { %v1103_v27 = vpop.eup %1102  ;;  %v682_v29 = vmul.f32 %v1099_v48, %v681_v26  ;;  %v608_v31 = vmul.f32 %v1101_v35, %v1570_v57  ;;  %v474_v32 = vpop.xlane.xlu2 %473  ;;  %vm614_vm12 = vweird.f32 %v1101_v35 }
 0x173   : > { %v418_v33 = vpop.xlane.xlu0 %417  ;;  %v648_v37 = vmul.f32 %v1103_v27, %v1572_v2  ;;  %v1594_v45 = vadd.f32 1e-05, %v558_v38  ;;  %v511_v56 = vmul.f32 0.0078125, %v474_v32  ;;  %vm654_vm13 = vweird.f32 %v1103_v27  ;;  %vm615_vm15 = vmor %vm613_vm14, %vm614_vm12 }
 0x174   : > { %v686_v39 = vsel %vm685_vm11, %v1099_v48, %v682_v29  ;;  %v609_v23 = vmul.f32 %v1101_v35, %v608_v31  ;;  %v1592_v41 = vmul.f32 0.0078125, %v418_v33  ;;  %v426_v42 = vpop.xlane.xlu1 %425  ;;  %vm655_vm1 = vmor %vm653_vm0, %vm654_vm13 }
 0x175   : > { %v765_v28 = vmul.f32 %v686_v39, %v573_v34  ;;  %v649_v43 = vmul.f32 %v1103_v27, %v648_v37  ;;  %v1596_v49 = vmul.f32 0.0078125, %v426_v42  ;;  %1104 = vrsqrt.f32 %v1594_v45 }
 0x176   : > { %v610_v53 = vmul.f32 0.5, %v609_v23  ;;  %v523_v55 = vmul.f32 %v1592_v41, %v1592_v41  ;;  %vm693_vm3 = vweird.f32 %v1594_v45 }
 0x177   : > { %v785_v58 = vmul.f32 %v1542_v16, %v765_v28  ;;  %v650_v59 = vmul.f32 0.5, %v649_v43  ;;  %v527_v1 = vmul.f32 %v1596_v49, %v1596_v49 }
 0x178   : > { %v611_v62 = vsub.f32 1.5, %v610_v53  ;;  %v539_v63 = vsub.f32 %v507_v44, %v523_v55  ;;  %v530_v44 = vmul.f32 %v1622_v21, %v1622_v21 }
 0x179   : > { %v805_v48 = vadd.f32 %v1549_v24, %v785_v58  ;;  %v651_v30 = vsub.f32 1.5, %v650_v59  ;;  %v543_v13 = vsub.f32 %v511_v56, %v527_v1  ;;  %v574_v58 = vsub.f32 %v1465_v54, %v1580_v18 }
 0x17a   : > { %v612_v4 = vmul.f32 %v1101_v35, %v611_v62  ;;  %v555_v46 = vmax.f32 %v539_v63, 0.0  ;;  %v468_v6 = vpop.xlane.xlu2 %467  ;;  %v571_v59 = vsub.f32 %v1474_v60, %v1592_v41 }
 0x17b   : > { %v458_v8 = vpop.xlane.xlu0 %457  ;;  %v821_v12 = vmax.f32 %v805_v48, 0.0  ;;  %v652_v14 = vmul.f32 %v1103_v27, %v651_v30  ;;  %v559_v25 = vmax.f32 %v543_v13, 0.0  ;;  %v1105_v26 = vpop.eup %1104  ;;  %v575_v48 = vsub.f32 %v1482_v0, %v1596_v49 }
 0x17c   : > { %v503_v15 = vmul.f32 0.0078125, %v458_v8  ;;  %v616_v20 = vsel %vm615_vm15, %v1101_v35, %v612_v4  ;;  %v1613_v22 = vadd.f32 1e-05, %v555_v46  ;;  %v412_v57 = vpop.xlane.xlu1 %411  ;;  %v688_v33 = vmul.f32 %v1105_v26, %v1594_v45 }
 0x17d   : > { %837 = vst [vmem:[%s1565_s15 + $0x40] sm:$0xff] %v821_v12  ;;  %v758_v19 = vmul.f32 %v616_v20, %v566_v9  ;;  %v656_v29 = vsel %vm655_vm1, %v1103_v27, %v652_v14  ;;  %v1619_v34 = vadd.f32 1e-05, %v559_v25  ;;  %v1633_v50 = vmul.f32 0.0078125, %v412_v57 }
 0x17e   : > { %v535_v31 = vsub.f32 %v503_v15, %v519_v40  ;;  %v762_v32 = vmul.f32 %v656_v29, %v570_v17  ;;  %1106 = vrsqrt.f32 %v1613_v22  ;;  %v689_v37 = vmul.f32 %v1105_v26, %v688_v33 }
 0x17f   : > { %v778_v2 = vmul.f32 %v1542_v16, %v758_v19  ;;  %1108 = vrsqrt.f32 %v1619_v34  ;;  %vm694_vm2 = vweird.f32 %v1105_v26  ;;  %vm663_vm5 = vweird.f32 %v1613_v22 }
 0x180   : > { %v551_v51 = vmax.f32 %v535_v31, 0.0  ;;  %v782_v35 = vmul.f32 %v1542_v16, %v762_v32  ;;  %v690_v23 = vmul.f32 0.5, %v689_v37  ;;  %vm695_vm4 = vmor %vm693_vm3, %vm694_vm2  ;;  %v508_v54 = vmul.f32 0.0078125, %v468_v6 }
 0x181   : > { %v798_v38 = vadd.f32 %v1549_v24, %v778_v2  ;;  %v520_v60 = vmul.f32 %v1633_v50, %v1633_v50  ;;  %vm703_vm6 = vweird.f32 %v1619_v34 }
 0x182   : > { %v1627_v27 = vadd.f32 1e-05, %v551_v51  ;;  %v802_v39 = vadd.f32 %v1549_v24, %v782_v35  ;;  %v428_v42 = vpop.xlane.xlu2 %427  ;;  %v691_v55 = vsub.f32 1.5, %v690_v23 }
 0x183   : > { %v1630_v28 = vpop.xlane.xlu0 %435  ;;  %v814_v43 = vmax.f32 %v798_v38, 0.0  ;;  %v1643_v63 = vmul.f32 0.0078125, %v428_v42 }
 0x184   : > { %1110 = vrsqrt.f32 %v1627_v27  ;;  %v1107_v53 = vpop.eup %1106  ;;  %v818_v56 = vmax.f32 %v802_v39, 0.0  ;;  %v420_v9 = vpop.xlane.xlu1 %419  ;;  %v692_v1 = vmul.f32 %v1105_v26, %v691_v55  ;;  %vm623_vm12 = vweird.f32 %v1627_v27 }
 0x185   : > { %830 = vst [vmem:[%s1565_s15 + $0x8] sm:$0xff] %v814_v43  ;;  %v658_v62 = vmul.f32 %v1107_v53, %v1613_v22  ;;  %v1649_v40 = vmul.f32 0.0078125, %v420_v9  ;;  %v1109_v30 = vpop.eup %1108  ;;  %vm664_vm7 = vweird.f32 %v1107_v53  ;;  %v528_v13 = vmul.f32 %v1643_v63, %v1643_v63 }
 0x186   : > { %834 = vst [vmem:[%s1565_s15 + $0x28] sm:$0xff] %v818_v56  ;;  %v696_v18 = vsel %vm695_vm4, %v1105_v26, %v692_v1  ;;  %v698_v41 = vmul.f32 %v1109_v30, %v1619_v34  ;;  %vm704_vm8 = vweird.f32 %v1109_v30  ;;  %vm665_vm10 = vmor %vm663_vm5, %vm664_vm7  ;;  %v1685_v34 = vmul.f32 0.0078125, %v1574_v5 }
 0x187   : > { %v659_v4 = vmul.f32 %v1107_v53, %v658_v62  ;;  %v524_v45 = vmul.f32 %v1649_v40, %v1649_v40  ;;  %v766_v49 = vmul.f32 %v696_v18, %v574_v58  ;;  %vm705_vm11 = vmor %vm703_vm6, %vm704_vm8  ;;  %v567_v18 = vsub.f32 %v1460_v52, %v1590_v36 }
 0x188   : > { %v699_v8 = vmul.f32 %v1109_v30, %v698_v41 }
 0x189   : > { %v660_v46 = vmul.f32 0.5, %v659_v4  ;;  %v540_v12 = vsub.f32 %v508_v54, %v524_v45  ;;  %v786_v17 = vmul.f32 %v1542_v16, %v766_v49  ;;  %v1680_v4 = vmul.f32 0.0078125, %v1630_v28 }
 0x18a   : > { %v1111_v0 = vpop.eup %1110  ;;  %v480_v14 = vpop.xlane.xlu2 %479  ;;  %v700_v26 = vmul.f32 0.5, %v699_v8 }
 0x18b   : > { %v618_v6 = vmul.f32 %v1111_v0, %v1627_v27  ;;  %v476_v15 = vpop.xlane.xlu0 %475  ;;  %v661_v20 = vsub.f32 1.5, %v660_v46  ;;  %v514_v25 = vmul.f32 0.0078125, %v480_v14  ;;  %vm624_vm9 = vweird.f32 %v1111_v0 }
 0x18c   : > { %v512_v57 = vmul.f32 0.0078125, %v476_v15  ;;  %v556_v29 = vmax.f32 %v540_v12, 0.0  ;;  %v460_v31 = vpop.xlane.xlu1 %459  ;;  %v806_v32 = vadd.f32 %v1549_v24, %v786_v17  ;;  %v701_v35 = vsub.f32 1.5, %v700_v26  ;;  %vm625_vm13 = vmor %vm623_vm12, %vm624_vm9 }
 0x18d   : > { %v619_v19 = vmul.f32 %v1111_v0, %v618_v6  ;;  %v662_v33 = vmul.f32 %v1107_v53, %v661_v20  ;;  %v546_v2 = vsub.f32 %v514_v25, %v530_v44  ;;  %v504_v39 = vmul.f32 0.0078125, %v460_v31 }
 0x18e   : > { %v544_v51 = vsub.f32 %v512_v57, %v528_v13  ;;  %v1666_v38 = vadd.f32 1e-05, %v556_v29  ;;  %v822_v23 = vmax.f32 %v806_v32, 0.0  ;;  %v702_v9 = vmul.f32 %v1109_v30, %v701_v35 }
 0x18f   : > { %v620_v37 = vmul.f32 0.5, %v619_v19  ;;  %v666_v42 = vsel %vm665_vm10, %v1107_v53, %v662_v33  ;;  %v562_v43 = vmax.f32 %v546_v2, 0.0  ;;  %v536_v62 = vsub.f32 %v504_v39, %v520_v60 }
 0x190   : > { %v560_v56 = vmax.f32 %v544_v51, 0.0  ;;  %v763_v55 = vmul.f32 %v666_v42, %v571_v59  ;;  %1112 = vrsqrt.f32 %v1666_v38  ;;  %838 = vst [vmem:[%s1565_s15 + $0x48] sm:$0xff] %v822_v23  ;;  %v706_v1 = vsel %vm705_vm11, %v1109_v30, %v702_v9 }
 0x191   : > { %v621_v58 = vsub.f32 1.5, %v620_v37  ;;  %v1674_v22 = vadd.f32 1e-05, %v562_v43  ;;  %v767_v27 = vmul.f32 %v706_v1, %v575_v48  ;;  %v552_v28 = vmax.f32 %v536_v62, 0.0 }
 0x192   : > { %v1676_v44 = vadd.f32 1e-05, %v560_v56  ;;  %v783_v53 = vmul.f32 %v1542_v16, %v763_v55  ;;  %v531_v48 = vmul.f32 %v1685_v34, %v1685_v34  ;;  %v532_v13 = vmul.f32 %v1680_v4, %v1680_v4 }
 0x193   : > { %v622_v59 = vmul.f32 %v1111_v0, %v621_v58  ;;  %v482_v54 = vpop.xlane.xlu0 %481  ;;  %1114 = vrsqrt.f32 %v1674_v22  ;;  %v787_v45 = vmul.f32 %v1542_v16, %v767_v27  ;;  %v1696_v8 = vadd.f32 1e-05, %v552_v28 }
 0x194   : > { %v803_v60 = vadd.f32 %v1549_v24, %v783_v53  ;;  %1116 = vrsqrt.f32 %v1676_v44  ;;  %v484_v30 = vpop.xlane.xlu1 %483  ;;  %v515_v52 = vmul.f32 0.0078125, %v482_v54  ;;  %vm673_vm15 = vweird.f32 %v1666_v38 }
 0x195   : > { %v626_v41 = vsel %vm625_vm13, %v1111_v0, %v622_v59  ;;  %v516_v36 = vmul.f32 0.0078125, %v484_v30  ;;  %v807_v0 = vadd.f32 %v1549_v24, %v787_v45  ;;  %1118 = vrsqrt.f32 %v1696_v8 }
 0x196   : > { %v759_v49 = vmul.f32 %v626_v41, %v567_v18  ;;  %v1113_v5 = vpop.eup %1112  ;;  %v819_v46 = vmax.f32 %v803_v60, 0.0  ;;  %v547_v14 = vsub.f32 %v515_v52, %v531_v48  ;;  %v572_v58 = vsub.f32 %v1490_v3, %v1649_v40 }
 0x197   : > { %v668_v12 = vmul.f32 %v1113_v5, %v1666_v38  ;;  %v548_v15 = vsub.f32 %v516_v36, %v532_v13  ;;  %v823_v20 = vmax.f32 %v807_v0, 0.0  ;;  %vm674_vm14 = vweird.f32 %v1113_v5 }
 0x198   : > { %v779_v6 = vmul.f32 %v1542_v16, %v759_v49  ;;  %835 = vst [vmem:[%s1565_s15 + $0x30] sm:$0xff] %v819_v46  ;;  %v563_v29 = vmax.f32 %v547_v14, 0.0  ;;  %vm675_vm0 = vmor %vm673_vm15, %vm674_vm14  ;;  %vm733_vm3 = vweird.f32 %v1674_v22  ;;  %v578_v38 = vsub.f32 %v1449_v47, %v1622_v21 }
 0x199   : > { %v1115_v17 = vpop.eup %1114  ;;  %v669_v57 = vmul.f32 %v1113_v5, %v668_v12  ;;  %v564_v31 = vmax.f32 %v548_v15, 0.0  ;;  %839 = vst [vmem:[%s1565_s15 + $0x50] sm:$0xff] %v823_v20  ;;  %vm713_vm5 = vweird.f32 %v1676_v44  ;;  %v576_v60 = vsub.f32 %v1502_v10, %v1643_v63 }
 0x19a   : > { %v799_v25 = vadd.f32 %v1549_v24, %v779_v6  ;;  %v1117_v26 = vpop.eup %1116  ;;  %v728_v19 = vmul.f32 %v1115_v17, %v1674_v22  ;;  %v1707_v35 = vadd.f32 1e-05, %v563_v29  ;;  %vm734_vm1 = vweird.f32 %v1115_v17 }
 0x19b   : > { %v670_v33 = vmul.f32 0.5, %v669_v57  ;;  %v708_v2 = vmul.f32 %v1117_v26, %v1676_v44  ;;  %v1709_v37 = vadd.f32 1e-05, %v564_v31  ;;  %v1119_v42 = vpop.eup %1118  ;;  %vm714_vm2 = vweird.f32 %v1117_v26  ;;  %vm735_vm4 = vmor %vm733_vm3, %vm734_vm1 }
 0x19c   : > { %v815_v32 = vmax.f32 %v799_v25, 0.0  ;;  %v729_v51 = vmul.f32 %v1115_v17, %v728_v19  ;;  %1120 = vrsqrt.f32 %v1707_v35  ;;  %v628_v9 = vmul.f32 %v1119_v42, %v1696_v8  ;;  %vm715_vm6 = vmor %vm713_vm5, %vm714_vm2 }
 0x19d   : > { %v671_v39 = vsub.f32 1.5, %v670_v33  ;;  %v709_v23 = vmul.f32 %v1117_v26, %v708_v2  ;;  %1122 = vrsqrt.f32 %v1709_v37  ;;  %vm634_vm7 = vweird.f32 %v1119_v42 }
 0x19e   : > { %831 = vst [vmem:[%s1565_s15 + $0x10] sm:$0xff] %v815_v32  ;;  %v730_v43 = vmul.f32 0.5, %v729_v51  ;;  %v629_v59 = vmul.f32 %v1119_v42, %v628_v9  ;;  %vm633_vm8 = vweird.f32 %v1696_v8  ;;  %vm743_vm11 = vweird.f32 %v1707_v35 }
 0x19f   : > { %v672_v56 = vmul.f32 %v1113_v5, %v671_v39  ;;  %v710_v55 = vmul.f32 0.5, %v709_v23  ;;  %vm635_vm9 = vmor %vm633_vm8, %vm634_vm7  ;;  %vm753_vm14 = vweird.f32 %v1709_v37  ;;  %v580_v32 = vsub.f32 %v1505_v11, %v1680_v4 }
 0x1a0   : > { %v731_v62 = vsub.f32 1.5, %v730_v43  ;;  %v630_v3 = vmul.f32 0.5, %v629_v59 }
 0x1a1   : > { %v676_v53 = vsel %vm675_vm0, %v1113_v5, %v672_v56  ;;  %v711_v1 = vsub.f32 1.5, %v710_v55  ;;  %v568_v5 = vsub.f32 %v1498_v7, %v1633_v50 }
 0x1a2   : > { %v764_v54 = vmul.f32 %v676_v53, %v572_v58  ;;  %v732_v18 = vmul.f32 %v1115_v17, %v731_v62  ;;  %v1121_v40 = vpop.eup %1120  ;;  %v631_v22 = vsub.f32 1.5, %v630_v3 }
 0x1a3   : > { %v712_v27 = vmul.f32 %v1117_v26, %v711_v1  ;;  %v738_v49 = vmul.f32 %v1121_v40, %v1707_v35  ;;  %v1123_v47 = vpop.eup %1122  ;;  %vm744_vm10 = vweird.f32 %v1121_v40 }
 0x1a4   : > { %v784_v41 = vmul.f32 %v1542_v16, %v764_v54  ;;  %v736_v28 = vsel %vm735_vm4, %v1115_v17, %v732_v18  ;;  %v632_v10 = vmul.f32 %v1119_v42, %v631_v22  ;;  %v748_v36 = vmul.f32 %v1123_v47, %v1709_v37  ;;  %vm745_vm13 = vmor %vm743_vm11, %vm744_vm10 }
 0x1a5   : > { %v770_v30 = vmul.f32 %v736_v28, %v578_v38  ;;  %v716_v45 = vsel %vm715_vm6, %v1117_v26, %v712_v27  ;;  %v739_v63 = vmul.f32 %v1121_v40, %v738_v49  ;;  %vm754_vm12 = vweird.f32 %v1123_v47 }
 0x1a6   : > { %v804_v21 = vadd.f32 %v1549_v24, %v784_v41  ;;  %v768_v44 = vmul.f32 %v716_v45, %v576_v60  ;;  %v636_v0 = vsel %vm635_vm9, %v1119_v42, %v632_v10  ;;  %v749_v8 = vmul.f32 %v1123_v47, %v748_v36  ;;  %vm755_vm15 = vmor %vm753_vm14, %vm754_vm12 }
 0x1a7   : > { %v790_v52 = vmul.f32 %v1542_v16, %v770_v30  ;;  %v740_v6 = vmul.f32 0.5, %v739_v63  ;;  %v760_v14 = vmul.f32 %v636_v0, %v568_v5  ;;  %v579_v26 = vsub.f32 %v1477_v61, %v1685_v34 }
 0x1a8   : > { %v820_v48 = vmax.f32 %v804_v21, 0.0  ;;  %v788_v46 = vmul.f32 %v1542_v16, %v768_v44  ;;  %v750_v7 = vmul.f32 0.5, %v749_v8 }
 0x1a9   : > { %v810_v13 = vadd.f32 %v1549_v24, %v790_v52  ;;  %v741_v17 = vsub.f32 1.5, %v740_v6  ;;  %v780_v20 = vmul.f32 %v1542_v16, %v760_v14 }
 0x1aa   : > { %836 = vst [vmem:[%s1565_s15 + $0x38] sm:$0xff] %v820_v48  ;;  %v808_v12 = vadd.f32 %v1549_v24, %v788_v46  ;;  %v751_v57 = vsub.f32 1.5, %v750_v7 }
 0x1ab   : > { %v826_v15 = vmax.f32 %v810_v13, 0.0  ;;  %v742_v25 = vmul.f32 %v1121_v40, %v741_v17  ;;  %v800_v19 = vadd.f32 %v1549_v24, %v780_v20 }
 0x1ac   : > { %v824_v50 = vmax.f32 %v808_v12, 0.0  ;;  %v752_v31 = vmul.f32 %v1123_v47, %v751_v57 }
 0x1ad   : > { %842 = vst [vmem:[%s1565_s15 + $0x68] sm:$0xff] %v826_v15  ;;  %v746_v29 = vsel %vm745_vm13, %v1121_v40, %v742_v25  ;;  %v816_v33 = vmax.f32 %v800_v19, 0.0 }
 0x1ae   : > { %840 = vst [vmem:[%s1565_s15 + $0x58] sm:$0xff] %v824_v50  ;;  %v771_v2 = vmul.f32 %v746_v29, %v579_v26  ;;  %v756_v51 = vsel %vm755_vm15, %v1123_v47, %v752_v31 }
 0x1af   : > { %832 = vst [vmem:[%s1565_s15 + $0x18] sm:$0xff] %v816_v33  ;;  %v772_v34 = vmul.f32 %v756_v51, %v580_v32 }
 0x1b0   : > { %v791_v61 = vmul.f32 %v1542_v16, %v771_v2 }
 0x1b1   : > { %v792_v11 = vmul.f32 %v1542_v16, %v772_v34 }
 0x1b2   : > { %v811_v35 = vadd.f32 %v1549_v24, %v791_v61 }
 0x1b3   : > { %v812_v37 = vadd.f32 %v1549_v24, %v792_v11 }
 0x1b4   : > { %v827_v4 = vmax.f32 %v811_v35, 0.0 }
 0x1b5   : > { %v828_v39 = vmax.f32 %v812_v37, 0.0 }
 0x1b6   : > { %843 = vst [vmem:[%s1565_s15 + $0x70] sm:$0xff] %v827_v4 }
 0x1b7   : > { %844 = vst [vmem:[%s1565_s15 + $0x78] sm:$0xff] %v828_v39 }
 0x1b8   : > { %1211 = shalt.err (!%p1208_p10)
}
 0x1b9   : > { %s1261_s28 = smov 128   ;;  %s1262_s8 = smov 8  }
 0x1ba   : > { %1032 = dma.vmem_to_hbm [thread:$0]  (%p1359_p5), %s859_s22, 2048, %s861_s26, %s846_s9, %s1261_s28, %s1261_s28, %s1262_s8  }
 0x1bb PF: > { %p1049_p11 = scmp.ge.s32.totalorder %s1254_s21, 2  ;;  %s875_s15 = sand.u32 1, %s1242_s18  }
 0x1bc   : > { %s876_s16 = scalar_lea.sflag [#allocation4], %s875_s15 }
 0x1bd   : > { %p1043_p12 = pnand %p1049_p11, %p1328_p6 }
 0x1bf   : > { %p1044_p13 = pneg %p1043_p12 }
 0x1c1   : > { %1237 = dma.done.wait (%p1044_p13), %s876_s16, 2048  }
 0x1c2   : > { %1239 = vsyncadd (%p1044_p13), %s876_s16, 4294965248  ;;  %p19_p0 = scmp.ge.s32.totalorder %s1345_s7, 6   ;;  %s1798_s18 = smov %s1246_s19 }
 0x1c3   : > { %s1799_s19 = smov %s1250_s20  ;;  %s1800_s20 = smov %s1355_s12 }
 0x1c4   : > { %s1801_s21 = smov %s1345_s7  ;;  %21 = sbr.rel (!%p19_p0) target bundleno = 6 (0x6), region = 89 }
 0x1c9   :  { %882 = vsyncpa [#allocation3], 1 }
 0x1ca   :  { %884 = vsyncpa [#allocation3 + $0x1], 1 }
 0x1cb   :  { %885 = vsyncpa [#allocation6], 1 }
 0x1cc   :  { %886 = vsyncpa [#allocation4], 1 }
 0x1cd   :  { %888 = vsyncpa [#allocation4 + $0x1], 1 }

// kernel: tpu_custom_call.1
= control target key start
LH: loop header
LB: loop body
LE: loop exit
PB: predicated region body
PF: predicated region fallthrough
CT: control target
= control target key end

     0   :  { %10 = vsyncpa [#allocation3], 0  ;;  %s1787_s0 = inlined_call_operand.hbm [shape: f32[512,128], index: 0, kind: input, shape index: {}]   ;;  %s1788_s1 = inlined_call_operand.hbm [shape: bf16[128,128], index: 1, kind: input, shape index: {}]   ;;  %s1789_s2 = inlined_call_operand.vmem [shape: f32[1,128], index: 2, kind: input, shape index: {}]   ;;  %s1790_s3 = inlined_call_operand.vmem [shape: f32[1,128], index: 3, kind: input, shape index: {}]   ;;  %s1791_s4 = inlined_call_operand.vmem [shape: f32[1,128], index: 4, kind: input, shape index: {}]   ;;  %s1792_s5 = inlined_call_operand.hbm [shape: f32[512,128], index: 5, kind: output, shape index: {}]  }
   0x1   :  { %12 = vsyncpa [#allocation3 + $0x1], 0 }
   0x2   :  { %13 = vsyncpa [#allocation6], 0 }
   0x3   :  { %14 = vsyncpa [#allocation4], 0 }
   0x4   :  { %16 = vsyncpa [#allocation4 + $0x1], 0  ;;  %s1293_s18 = smov 0   ;;  %s1295_s19 = smov 0  }
   0x5   :  { %s1297_s20 = smov 0   ;;  %s1299_s21 = smov 0  }
   0x6 LB: > { %s1314_s22 = sadd.s32 4294967295, %s1254_s21   ;;  %s944_s23 = sadd.s32 4294967294, %s1254_s21   ;;  %s1254_s21 = sphi %s1299_s21, %s1801_s21   ;;  %s1250_s20 = sphi %s1297_s20, %s1800_s20   ;;  %s1246_s19 = sphi %s1295_s19, %s1799_s19   ;;  %s1242_s18 = sphi %s1293_s18, %s1798_s18  }
   0x7   : > { %p42_p0 = scmp.ne.s32.totalorder %s1246_s19, %s1242_s18  ;;  %p43_p1 = scmp.eq.s32.totalorder %s1314_s22, 0 }
   0x8   : > { %p150_p2 = scmp.eq.s32.totalorder %s1314_s22, 3  ;;  %p156_p3 = scmp.eq.s32.totalorder %s944_s23, 3 }
   0x9   : > { %p1323_p4 = por %p43_p1, %p42_p0  ;;  %p945_p5 = scmp.ge.s32.totalorder %s1254_s21, 1 }
   0xa   : > { %p1328_p6 = por %p156_p3, %p42_p0  ;;  %p163_p7 = scmp.lt.s32.totalorder %s1254_s21, 5 }
   0xb   : > { %s174_s28 = sshll.u32 %s1788_s1, 4  ;;  %s1256_s30 = smov [#allocation5]   ;;  %s175_s28 = int_to_ptr.hbm [resolvable:$true] %s174_s28 }
   0xc   : > { %p1336_p8 = pnand %p945_p5, %p163_p7  ;;  %s176_s6 = sshll.u32 %s1256_s30, 4  ;;  %s177_s6 = int_to_ptr.vmem [resolvable:$true] %s176_s6 }
   0xd   : > { %s1345_s7 = sadd.s32 1, %s1254_s21   ;;  %s1257_s8 = smov 64  }
   0xe   : > { %p1034_p9 = pneg %p1336_p8  ;;  %s1258_s9 = smov 4  }
   0xf   : > { %s26_s10 = ssub.s32 %s1254_s21, %s1345_s7  ;;  %s29_s11 = sadd.s32 1, %s1250_s20 }
  0x10   : > { %p1035_p10 = pnand %p1034_p9, %p43_p1  ;;  %p27_p11 = scmp.eq.s32.totalorder %s26_s10, 0 }
  0x11   : > { %p36_p12 = scmp.ne.s32.totalorder %s1250_s20, %s1246_s19  ;;  %p37_p13 = scmp.eq.s32.totalorder %s1254_s21, 0 }
  0x12   : > { %1037 = dma.hbm_to_vmem [thread:$0]  (!%p1035_p10), %s175_s28, 1024, %s177_s6, [#allocation6], %s1257_s8, %s1257_s8, %s1258_s9  }
  0x13   : > { %p1047_p0 = scmp.lt.s32.totalorder %s1254_s21, 4  ;;  %p38_p3 = por %p37_p13, %p36_p12 }
  0x14   : > { %s1355_s12 = scalar_select %p27_p11, %s1250_s20, %s29_s11  }
  0x15   : > { %p1359_p5 = por %p150_p2, %p36_p12  ;;  %s199_s14 = sand.u32 1, %s1250_s20  }
  0x16   : > { %s992_s15 = sshll.u32 %s1254_s21, 7  ;;  %s948_s16 = sshll.u32 %s199_s14, 7 }
  0x17   : > { %s208_s26 = scalar_lea.hbm %s1787_s0, %s992_s15  ;;  %s203_s28 = scalar_lea.vmem [#allocation2], %s948_s16 }
  0x18   : > { %s209_s27 = sshll.u32 %s208_s26, 4  ;;  %s211_s30 = sshll.u32 %s203_s28, 4  ;;  %s210_s27 = int_to_ptr.hbm [resolvable:$true] %s209_s27  ;;  %s212_s30 = int_to_ptr.vmem [resolvable:$true] %s211_s30 }
  0x19   : > { %p1370_p7 = pnand %p1047_p0, %p38_p3  ;;  %s200_s8 = scalar_lea.sflag [#allocation3], %s199_s14 }
  0x1a   : > { %s1154_s9 = sshra.s32 %s210_s27, 4  ;;  %s1161_s16 = scalar_lea.hbm %s1787_s0, 512  ;;  %s1155_s9 = int_to_ptr.hbm [resolvable:$true] %s1154_s9 }
  0x1b   : > { %s1156_s10 = scalar_lea.hbm %s1155_s9, 128  ;;  %p1158_p9 = pneg %p1370_p7 }
  0x1c   : > { %p1157_p2 = scmp.ne.s32.totalorder %s1155_s9, %s1156_s10  ;;  %p1162_p12 = scmp.lt.s32.totalorder %s1155_s9, %s1787_s0 }
  0x1d   : > { %p1163_p13 = scmp.lt.s32.totalorder %s1161_s16, %s1156_s10 }
  0x1e   : > { %p1159_p10 = pnand %p1158_p9, %p1157_p2 }
  0x1f   : > { %p1164_p0 = por %p1163_p13, %p1162_p12 }
  0x20   : > { %p1160_p11 = pneg %p1159_p10 }
  0x22   : > { %p1165_p3 = pnand %p1164_p0, %p1160_p11 }
  0x24   : > { %1168 = shalt.err (!%p1165_p3)
}
  0x25   : > { %s1259_s14 = smov 128   ;;  %s1260_s26 = smov 8  }
  0x26   : > { %1041 = dma.hbm_to_vmem [thread:$0]  (!%p1370_p7), %s210_s27, 2048, %s212_s30, %s200_s8, %s1259_s14, %s1259_s14, %s1260_s26  }
  0x27   : > { %223 = sbr.rel (%p1336_p8) target bundleno = 443 (0x1bb), region = 40  ;;  %s1387_s28 = sand.u32 (!%p1336_p8), 1, %s1246_s19  }
  0x28   : > { %s952_s9 = sshll.u32 (!%p1336_p8), %s1387_s28, 7  ;;  %s226_s10 = scalar_lea.sflag (!%p1336_p8), [#allocation3], %s1387_s28 }
  0x29   : > { %s1393_s11 = scalar_lea.vmem (!%p1336_p8), [#allocation2], %s952_s9 }
  0x2c   : > { %1229 = dma.done.wait (%p1323_p4), %s226_s10, 2048  }
  0x2d   : > { %1231 = vsyncadd (%p1323_p4), %s226_s10, 4294965248 }
  0x2e   : > { %1233 = dma.done.wait (%p43_p1), [#allocation6], 1024  }
  0x2f   : > { %1235 = vsyncadd (%p43_p1), [#allocation6], 4294966272  ;;  %v1000_v0 = vld [vmem:[#allocation5 + $0x38] sm:$0xff]  ;;  %v999_v1 = vld [vmem:[#allocation5 + $0x30] sm:$0xff]  ;;  %s1565_s15 = scalar_lea.vmem [#allocation7], %s952_s9  ;;  %s1001_s16 = sshll.u32 %s1314_s22, 7 }
  0x30   : > { %356 = vmatpush.bf16.msra.mxu0 %v1000_v0  ;;  %1002 = vmatpush.bf16.msra.mxu1 %v1000_v0  ;;  %v998_v2 = vld [vmem:[#allocation5 + $0x28] sm:$0xff]  ;;  %v997_v3 = vld [vmem:[#allocation5 + $0x20] sm:$0xff]  ;;  %v996_v4 = vld [vmem:[#allocation5 + $0x18] sm:$0xff]  ;;  %s857_s14 = scalar_lea.hbm %s1792_s5, %s1001_s16  ;;  %s858_s22 = sshll.u32 %s1565_s15, 4  ;;  %s859_s22 = int_to_ptr.vmem [resolvable:$true] %s858_s22 }
  0x31   : > { %1004 = vmatpush.bf16.msra.mxu3 %v1000_v0  ;;  %1003 = vmatpush.bf16.msra.mxu2 %v1000_v0  ;;  %v995_v5 = vld [vmem:[#allocation5 + $0x10] sm:$0xff]  ;;  %v994_v6 = vld [vmem:[#allocation5 + $0x8] sm:$0xff]  ;;  %v993_v7 = vld [vmem:[#allocation5] sm:$0xff]  ;;  %s860_s26 = sshll.u32 %s857_s14, 4  ;;  %s846_s9 = scalar_lea.sflag [#allocation4], %s1387_s28  ;;  %s861_s26 = int_to_ptr.hbm [resolvable:$true] %s860_s26 }
  0x32   : > { %v264_v8 = vld [vmem:[%s1393_s11] sm:$0xff]  ;;  %v265_v9 = vld [vmem:[%s1393_s11 + $0x8] sm:$0xff]  ;;  %v266_v20 = vld [vmem:[%s1393_s11 + $0x10] sm:$0xff]  ;;  %s1198_s10 = sshra.s32 %s861_s26, 4  ;;  %s1204_s27 = scalar_lea.hbm %s1792_s5, 512  ;;  %s1199_s10 = int_to_ptr.hbm [resolvable:$true] %s1198_s10 }
  0x33   : > { %v268_v10 = vld [vmem:[%s1393_s11 + $0x20] sm:$0xff]  ;;  %v269_v11 = vld [vmem:[%s1393_s11 + $0x28] sm:$0xff]  ;;  %v280_v16 = vpack.c.bf16 %v265_v9, %v264_v8  ;;  %v267_v21 = vld [vmem:[%s1393_s11 + $0x18] sm:$0xff]  ;;  %p1205_p7 = scmp.lt.s32.totalorder %s1199_s10, %s1792_s5 }
  0x34   : > { %357 = vmatpush.bf16.msra.mxu0 %v999_v1  ;;  %1005 = vmatpush.bf16.msra.mxu1 %v999_v1  ;;  %v276_v12 = vld [vmem:[%s1393_s11 + $0x60] sm:$0xff]  ;;  %v277_v13 = vld [vmem:[%s1393_s11 + $0x68] sm:$0xff]  ;;  %v282_v17 = vpack.c.bf16 %v269_v11, %v268_v10  ;;  %v270_v22 = vld [vmem:[%s1393_s11 + $0x30] sm:$0xff]  ;;  %v281_v28 = vpack.c.bf16 %v267_v21, %v266_v20 }
  0x35   : > { %1007 = vmatpush.bf16.msra.mxu3 %v999_v1  ;;  %1006 = vmatpush.bf16.msra.mxu2 %v999_v1  ;;  %v272_v14 = vld [vmem:[%s1393_s11 + $0x40] sm:$0xff]  ;;  %v273_v15 = vld [vmem:[%s1393_s11 + $0x48] sm:$0xff]  ;;  %v286_v18 = vpack.c.bf16 %v277_v13, %v276_v12  ;;  %v271_v23 = vld [vmem:[%s1393_s11 + $0x38] sm:$0xff] }
  0x36   : > { %v284_v19 = vpack.c.bf16 %v273_v15, %v272_v14  ;;  %v278_v24 = vld [vmem:[%s1393_s11 + $0x70] sm:$0xff]  ;;  %v279_v25 = vld [vmem:[%s1393_s11 + $0x78] sm:$0xff]  ;;  %v283_v29 = vpack.c.bf16 %v271_v23, %v270_v22  ;;  %v1422_v32 = vld [vmem:[%s1789_s2] ss:$0 sm:$0xff] }
  0x37   : > { %v274_v26 = vld [vmem:[%s1393_s11 + $0x50] sm:$0xff]  ;;  %v275_v27 = vld [vmem:[%s1393_s11 + $0x58] sm:$0xff]  ;;  %v287_v30 = vpack.c.bf16 %v279_v25, %v278_v24  ;;  %s1200_s11 = scalar_lea.hbm %s1199_s10, 128 }
  0x38   : > { %358 = vmatpush.bf16.msra.mxu0 %v998_v2  ;;  %1008 = vmatpush.bf16.msra.mxu1 %v998_v2  ;;  %v285_v31 = vpack.c.bf16 %v275_v27, %v274_v26  ;;  %p1201_p1 = scmp.ne.s32.totalorder %s1199_s10, %s1200_s11  ;;  %p1206_p2 = scmp.lt.s32.totalorder %s1204_s27, %s1200_s11 }
  0x39   : > { %1010 = vmatpush.bf16.msra.mxu3 %v998_v2  ;;  %1009 = vmatpush.bf16.msra.mxu2 %v998_v2 }
  0x3a   : > { %p1202_p4 = pnand %p1201_p1, %p1359_p5  ;;  %p1207_p9 = por %p1206_p2, %p1205_p7 }
  0x3c   : > { %359 = vmatpush.bf16.msra.mxu0 %v997_v3  ;;  %1011 = vmatpush.bf16.msra.mxu1 %v997_v3  ;;  %p1203_p8 = pneg %p1202_p4 }
  0x3d   : > { %1013 = vmatpush.bf16.msra.mxu3 %v997_v3  ;;  %1012 = vmatpush.bf16.msra.mxu2 %v997_v3 }
  0x3e   : > { %p1208_p10 = pnand %p1207_p9, %p1203_p8 }
  0x40   : > { %360 = vmatpush.bf16.msra.mxu0 %v996_v4  ;;  %1014 = vmatpush.bf16.msra.mxu1 %v996_v4 }
  0x41   : > { %1016 = vmatpush.bf16.msra.mxu3 %v996_v4  ;;  %1015 = vmatpush.bf16.msra.mxu2 %v996_v4 }
  0x44   : > { %361 = vmatpush.bf16.msra.mxu0 %v995_v5  ;;  %1017 = vmatpush.bf16.msra.mxu1 %v995_v5 }
  0x45   : > { %1019 = vmatpush.bf16.msra.mxu3 %v995_v5  ;;  %1018 = vmatpush.bf16.msra.mxu2 %v995_v5 }
  0x48   : > { %362 = vmatpush.bf16.msra.mxu0 %v994_v6  ;;  %1020 = vmatpush.bf16.msra.mxu1 %v994_v6 }
  0x49   : > { %1022 = vmatpush.bf16.msra.mxu3 %v994_v6  ;;  %1021 = vmatpush.bf16.msra.mxu2 %v994_v6 }
  0x4c   : > { %363 = vmatpush.bf16.msra.mxu0 %v993_v7  ;;  %1023 = vmatpush.bf16.msra.mxu1 %v993_v7 }
  0x4d   : > { %1025 = vmatpush.bf16.msra.mxu3 %v993_v7  ;;  %1024 = vmatpush.bf16.msra.mxu2 %v993_v7 }
  0x4f   : > { %364 = vmatmul.bf16.vlgmr.msra.gmra.mxu0 %v280_v16  ;;  %374 = vmatmul.bf16.vlgmr.msra.gmra.mxu1 %v282_v17 }
  0x50   : > { %394 = vmatmul.bf16.vlgmr.msra.gmra.mxu3 %v286_v18  ;;  %384 = vmatmul.bf16.vlgmr.msra.gmra.mxu2 %v284_v19 }
  0x5f   : > { %369 = vmatmul.bf16.gmra.mxu0 %v281_v28  ;;  %379 = vmatmul.bf16.gmra.mxu1 %v283_v29 }
  0x60   : > { %399 = vmatmul.bf16.gmra.mxu3 %v287_v30  ;;  %389 = vmatmul.bf16.gmra.mxu2 %v285_v31 }
  0xcc   : > { %v365_v33 = vpop.f32.mrf.mxu0  ;;  %v375_v34 = vpop.f32.mrf.mxu1 }
  0xcd   : > { %v1425_v35 = vadd.f32 %v1422_v32, %v365_v33  ;;  %v1428_v36 = vadd.f32 %v1422_v32, %v375_v34 }
  0xcf   : > { %413 = vadd.xlane.f32.xlu2 %v1428_v36  ;;  %405 = vadd.xlane.f32.xlu0 %v1425_v35  ;;  %v437_v37 = vmul.f32 %v1425_v35, %v1425_v35  ;;  %v441_v39 = vmul.f32 %v1428_v36, %v1428_v36 }
  0xd1   : > { %453 = vadd.xlane.f32.xlu1 %v437_v37 }
  0xd3   : > { %v395_v38 = vpop.f32.mrf.mxu3  ;;  %v385_v42 = vpop.f32.mrf.mxu2 }
  0xd4   : > { %v1437_v40 = vadd.f32 %v1422_v32, %v395_v38  ;;  %v367_v43 = vpop.f32.mrf.mxu0  ;;  %v1443_v44 = vadd.f32 %v1422_v32, %v385_v42  ;;  %v377_v48 = vpop.f32.mrf.mxu1 }
  0xd5   : > { %v1446_v46 = vadd.f32 %v1422_v32, %v367_v43  ;;  %v1457_v51 = vadd.f32 %v1422_v32, %v377_v48 }
  0xd6   : > { %v449_v41 = vmul.f32 %v1437_v40, %v1437_v40  ;;  %v445_v49 = vmul.f32 %v1443_v44, %v1443_v44 }
  0xd7   : > { %461 = vadd.xlane.f32.xlu2 %v441_v39  ;;  %429 = vadd.xlane.f32.xlu0 %v1437_v40  ;;  %v438_v55 = vmul.f32 %v1446_v46, %v1446_v46  ;;  %v442_v56 = vmul.f32 %v1457_v51, %v1457_v51 }
  0xd9   : > { %477 = vadd.xlane.f32.xlu1 %v449_v41 }
  0xdb   : > { %v397_v45 = vpop.f32.mrf.mxu3  ;;  %v387_v53 = vpop.f32.mrf.mxu2 }
  0xdc   : > { %v1449_v47 = vadd.f32 %v1422_v32, %v397_v45  ;;  %v370_v50 = vpop.f32.mrf.mxu0  ;;  %v1465_v54 = vadd.f32 %v1422_v32, %v387_v53  ;;  %v380_v58 = vpop.f32.mrf.mxu1 }
  0xdd   : > { %v1460_v52 = vadd.f32 %v1422_v32, %v370_v50  ;;  %v1474_v60 = vadd.f32 %v1422_v32, %v380_v58 }
  0xde   : > { %v446_v57 = vmul.f32 %v1465_v54, %v1465_v54  ;;  %v450_v12 = vmul.f32 %v1449_v47, %v1449_v47 }
  0xdf   : > { %421 = vadd.xlane.f32.xlu2 %v1443_v44  ;;  %407 = vadd.xlane.f32.xlu0 %v1446_v46  ;;  %v443_v62 = vmul.f32 %v1474_v60, %v1474_v60  ;;  %v439_v6 = vmul.f32 %v1460_v52, %v1460_v52 }
  0xe1   : > { %431 = vadd.xlane.f32.xlu1 %v1449_v47 }
  0xe3   : > { %v400_v59 = vpop.f32.mrf.mxu3  ;;  %v390_v63 = vpop.f32.mrf.mxu2 }
  0xe4   : > { %v1477_v61 = vadd.f32 %v1422_v32, %v400_v59  ;;  %v1482_v0 = vadd.f32 %v1422_v32, %v390_v63  ;;  %v382_v2 = vpop.f32.mrf.mxu1  ;;  %v372_v4 = vpop.f32.mrf.mxu0 }
  0xe5   : > { %v1490_v3 = vadd.f32 %v1422_v32, %v382_v2  ;;  %v1498_v7 = vadd.f32 %v1422_v32, %v372_v4 }
  0xe6   : > { %v447_v1 = vmul.f32 %v1482_v0, %v1482_v0  ;;  %v451_v15 = vmul.f32 %v1477_v61, %v1477_v61 }
  0xe7   : > { %415 = vadd.xlane.f32.xlu2 %v1457_v51  ;;  %469 = vadd.xlane.f32.xlu0 %v445_v49  ;;  %v444_v5 = vmul.f32 %v1490_v3, %v1490_v3  ;;  %v440_v14 = vmul.f32 %v1498_v7, %v1498_v7 }
  0xe9   : > { %409 = vadd.xlane.f32.xlu1 %v1460_v52 }
  0xeb   : > { %v392_v8 = vpop.f32.mrf.mxu2  ;;  %v402_v9 = vpop.f32.mrf.mxu3 }
  0xec   : > { %v1502_v10 = vadd.f32 %v1422_v32, %v392_v8  ;;  %v1505_v11 = vadd.f32 %v1422_v32, %v402_v9 }
  0xee   : > { %v448_v13 = vmul.f32 %v1502_v10, %v1502_v10  ;;  %v452_v16 = vmul.f32 %v1505_v11, %v1505_v11 }
  0xef   : > { %455 = vadd.xlane.f32.xlu2 %v438_v55  ;;  %463 = vadd.xlane.f32.xlu0 %v442_v56 }
  0xf1   : > { %471 = vadd.xlane.f32.xlu1 %v446_v57 }
  0xf7   : > { %433 = vadd.xlane.f32.xlu2 %v1477_v61  ;;  %423 = vadd.xlane.f32.xlu0 %v1465_v54 }
  0xf9   : > { %465 = vadd.xlane.f32.xlu1 %v443_v62 }
  0xff   : > { %473 = vadd.xlane.f32.xlu2 %v447_v1  ;;  %417 = vadd.xlane.f32.xlu0 %v1474_v60 }
 0x101   : > { %425 = vadd.xlane.f32.xlu1 %v1482_v0 }
 0x107   : > { %467 = vadd.xlane.f32.xlu2 %v444_v5  ;;  %457 = vadd.xlane.f32.xlu0 %v439_v6 }
 0x109   : > { %411 = vadd.xlane.f32.xlu1 %v1498_v7 }
 0x10f   : > { %427 = vadd.xlane.f32.xlu2 %v1502_v10  ;;  %435 = vadd.xlane.f32.xlu0 %v1505_v11 }
 0x111   : > { %419 = vadd.xlane.f32.xlu1 %v1490_v3 }
 0x117   : > { %479 = vadd.xlane.f32.xlu2 %v450_v12  ;;  %475 = vadd.xlane.f32.xlu0 %v448_v13 }
 0x119   : > { %459 = vadd.xlane.f32.xlu1 %v440_v14 }
 0x11f   : > { %481 = vadd.xlane.f32.xlu0 %v451_v15 }
 0x121   : > { %483 = vadd.xlane.f32.xlu1 %v452_v16  ;;  %v1542_v16 = vld [vmem:[%s1790_s3] ss:$0 sm:$0xff] }
 0x142   : > { %v414_v17 = vpop.xlane.xlu2 %413  ;;  %v406_v18 = vpop.xlane.xlu0 %405 }
 0x143   : > { %v485_v19 = vmul.f32 0.0078125, %v406_v18  ;;  %v1520_v23 = vmul.f32 0.0078125, %v414_v17 }
 0x144   : > { %v454_v20 = vpop.xlane.xlu1 %453 }
 0x145   : > { %v517_v21 = vmul.f32 %v485_v19, %v485_v19  ;;  %v501_v22 = vmul.f32 0.0078125, %v454_v20  ;;  %v521_v25 = vmul.f32 %v1520_v23, %v1520_v23  ;;  %v565_v15 = vsub.f32 %v1425_v35, %v485_v19 }
 0x146   : > { %v569_v19 = vsub.f32 %v1428_v36, %v1520_v23 }
 0x147   : > { %v533_v24 = vsub.f32 %v501_v22, %v517_v21 }
 0x149   : > { %v549_v26 = vmax.f32 %v533_v24, 0.0  ;;  %v1549_v24 = vld [vmem:[%s1791_s4] ss:$0 sm:$0xff] }
 0x14a   : > { %v462_v27 = vpop.xlane.xlu2 %461  ;;  %v430_v28 = vpop.xlane.xlu0 %429 }
 0x14b   : > { %v505_v29 = vmul.f32 0.0078125, %v462_v27  ;;  %v1524_v30 = vmul.f32 0.0078125, %v430_v28  ;;  %v581_v31 = vadd.f32 1e-05, %v549_v26 }
 0x14c   : > { %v478_v32 = vpop.xlane.xlu1 %477 }
 0x14d   : > { %v537_v33 = vsub.f32 %v505_v29, %v521_v25  ;;  %v529_v34 = vmul.f32 %v1524_v30, %v1524_v30  ;;  %v513_v37 = vmul.f32 0.0078125, %v478_v32  ;;  %1092 = vrsqrt.f32 %v581_v31 }
 0x14e   : > { %vm603_vm1 = vweird.f32 %v581_v31 }
 0x14f   : > { %v553_v38 = vmax.f32 %v537_v33, 0.0  ;;  %v545_v39 = vsub.f32 %v513_v37, %v529_v34 }
 0x151   : > { %v585_v41 = vadd.f32 1e-05, %v553_v38  ;;  %v561_v42 = vmax.f32 %v545_v39, 0.0 }
 0x152   : > { %v422_v43 = vpop.xlane.xlu2 %421  ;;  %v408_v45 = vpop.xlane.xlu0 %407 }
 0x153   : > { %1094 = vrsqrt.f32 %v585_v41  ;;  %v593_v48 = vadd.f32 1e-05, %v561_v42  ;;  %v1093_v49 = vpop.eup %1092  ;;  %v1530_v56 = vmul.f32 0.0078125, %v422_v43  ;;  %v1536_v13 = vmul.f32 0.0078125, %v408_v45 }
 0x154   : > { %v1528_v50 = vpop.xlane.xlu1 %431  ;;  %v598_v53 = vmul.f32 %v1093_v49, %v581_v31  ;;  %vm604_vm0 = vweird.f32 %v1093_v49  ;;  %vm643_vm4 = vweird.f32 %v585_v41  ;;  %v577_v45 = vsub.f32 %v1437_v40, %v1524_v30 }
 0x155   : > { %1096 = vrsqrt.f32 %v593_v48  ;;  %v525_v59 = vmul.f32 %v1530_v56, %v1530_v56  ;;  %vm605_vm2 = vmor %vm603_vm1, %vm604_vm0  ;;  %v518_v27 = vmul.f32 %v1536_v13, %v1536_v13  ;;  %vm723_vm7 = vweird.f32 %v593_v48 }
 0x156   : > { %v599_v55 = vmul.f32 %v1093_v49, %v598_v53 }
 0x158   : > { %v600_v58 = vmul.f32 0.5, %v599_v55 }
 0x159   : > { %v1095_v57 = vpop.eup %1094 }
 0x15a   : > { %v638_v62 = vmul.f32 %v1095_v57, %v585_v41  ;;  %v416_v63 = vpop.xlane.xlu2 %415  ;;  %v470_v1 = vpop.xlane.xlu0 %469  ;;  %v601_v4 = vsub.f32 1.5, %v600_v58  ;;  %vm644_vm3 = vweird.f32 %v1095_v57 }
 0x15b   : > { %v1097_v2 = vpop.eup %1096  ;;  %v509_v5 = vmul.f32 0.0078125, %v470_v1  ;;  %v1544_v21 = vmul.f32 0.0078125, %v416_v63  ;;  %vm645_vm6 = vmor %vm643_vm4, %vm644_vm3 }
 0x15c   : > { %v639_v6 = vmul.f32 %v1095_v57, %v638_v62  ;;  %v718_v8 = vmul.f32 %v1097_v2, %v593_v48  ;;  %v1534_v9 = vpop.xlane.xlu1 %409  ;;  %v602_v12 = vmul.f32 %v1093_v49, %v601_v4  ;;  %vm724_vm5 = vweird.f32 %v1097_v2 }
 0x15d   : > { %v541_v14 = vsub.f32 %v509_v5, %v525_v59  ;;  %v522_v37 = vmul.f32 %v1544_v21, %v1544_v21  ;;  %vm725_vm8 = vmor %vm723_vm7, %vm724_vm5 }
 0x15e   : > { %v640_v17 = vmul.f32 0.5, %v639_v6  ;;  %v719_v18 = vmul.f32 %v1097_v2, %v718_v8  ;;  %v606_v20 = vsel %vm605_vm2, %v1093_v49, %v602_v12 }
 0x15f   : > { %v557_v22 = vmax.f32 %v541_v14, 0.0  ;;  %v757_v25 = vmul.f32 %v606_v20, %v565_v15 }
 0x160   : > { %v641_v26 = vsub.f32 1.5, %v640_v17  ;;  %v720_v35 = vmul.f32 0.5, %v719_v18 }
 0x161   : > { %v589_v28 = vadd.f32 1e-05, %v557_v22  ;;  %v777_v29 = vmul.f32 %v1542_v16, %v757_v25 }
 0x162   : > { %v642_v31 = vmul.f32 %v1095_v57, %v641_v26  ;;  %v721_v32 = vsub.f32 1.5, %v720_v35  ;;  %v456_v33 = vpop.xlane.xlu2 %455  ;;  %v464_v34 = vpop.xlane.xlu0 %463 }
 0x163   : > { %1098 = vrsqrt.f32 %v589_v28  ;;  %v502_v38 = vmul.f32 0.0078125, %v456_v33  ;;  %v506_v39 = vmul.f32 0.0078125, %v464_v34  ;;  %v797_v36 = vadd.f32 %v1549_v24, %v777_v29 }
 0x164   : > { %v646_v23 = vsel %vm645_vm6, %v1095_v57, %v642_v31  ;;  %v722_v41 = vmul.f32 %v1097_v2, %v721_v32  ;;  %v472_v42 = vpop.xlane.xlu1 %471  ;;  %vm683_vm10 = vweird.f32 %v589_v28  ;;  %v573_v34 = vsub.f32 %v1443_v44, %v1530_v56 }
 0x165   : > { %v761_v43 = vmul.f32 %v646_v23, %v569_v19  ;;  %v534_v49 = vsub.f32 %v502_v38, %v518_v27  ;;  %v538_v53 = vsub.f32 %v506_v39, %v522_v37  ;;  %v813_v55 = vmax.f32 %v797_v36, 0.0 }
 0x166   : > { %v726_v58 = vsel %vm725_vm8, %v1097_v2, %v722_v41  ;;  %v510_v22 = vmul.f32 0.0078125, %v472_v42  ;;  %v1590_v36 = vmul.f32 0.0078125, %v1534_v9  ;;  %v566_v9 = vsub.f32 %v1446_v46, %v1536_v13 }
 0x167   : > { %v781_v59 = vmul.f32 %v1542_v16, %v761_v43  ;;  %v769_v62 = vmul.f32 %v726_v58, %v577_v45  ;;  %v550_v63 = vmax.f32 %v534_v49, 0.0  ;;  %v554_v1 = vmax.f32 %v538_v53, 0.0  ;;  %829 = vst [vmem:[%s1565_s15] sm:$0xff] %v813_v55 }
 0x169   : > { %v1099_v48 = vpop.eup %1098  ;;  %v801_v40 = vadd.f32 %v1549_v24, %v781_v59  ;;  %v789_v30 = vmul.f32 %v1542_v16, %v769_v62  ;;  %v1570_v57 = vadd.f32 1e-05, %v550_v63  ;;  %v1572_v2 = vadd.f32 1e-05, %v554_v1 }
 0x16a   : > { %v678_v4 = vmul.f32 %v1099_v48, %v589_v28  ;;  %v1574_v5 = vpop.xlane.xlu2 %433  ;;  %v424_v6 = vpop.xlane.xlu0 %423  ;;  %vm684_vm9 = vweird.f32 %v1099_v48 }
 0x16b   : > { %v817_v8 = vmax.f32 %v801_v40, 0.0  ;;  %v809_v12 = vadd.f32 %v1549_v24, %v789_v30  ;;  %1100 = vrsqrt.f32 %v1570_v57  ;;  %v1580_v18 = vmul.f32 0.0078125, %v424_v6  ;;  %vm685_vm11 = vmor %vm683_vm10, %vm684_vm9 }
 0x16c   : > { %v679_v14 = vmul.f32 %v1099_v48, %v678_v4  ;;  %1102 = vrsqrt.f32 %v1572_v2  ;;  %v466_v15 = vpop.xlane.xlu1 %465  ;;  %v519_v40 = vmul.f32 %v1590_v36, %v1590_v36  ;;  %vm613_vm14 = vweird.f32 %v1570_v57 }
 0x16d   : > { %833 = vst [vmem:[%s1565_s15 + $0x20] sm:$0xff] %v817_v8  ;;  %v825_v17 = vmax.f32 %v809_v12, 0.0  ;;  %v526_v25 = vmul.f32 %v1580_v18, %v1580_v18  ;;  %v507_v44 = vmul.f32 0.0078125, %v466_v15  ;;  %vm653_vm0 = vweird.f32 %v1572_v2 }
 0x16e   : > { %v680_v20 = vmul.f32 0.5, %v679_v14 }
 0x16f   : > { %841 = vst [vmem:[%s1565_s15 + $0x60] sm:$0xff] %v825_v17  ;;  %v542_v19 = vsub.f32 %v510_v22, %v526_v25  ;;  %v570_v17 = vsub.f32 %v1457_v51, %v1544_v21  ;;  %v1622_v21 = vmul.f32 0.0078125, %v1528_v50 }
 0x170   : > { %v681_v26 = vsub.f32 1.5, %v680_v20 }
 0x171   : > { %v1101_v35 = vpop.eup %1100  ;;  %v558_v38 = vmax.f32 %v542_v19, 0.0 }
 0x172   : > { %v1103_v27 = vpop.eup %1102  ;;  %v682_v29 = vmul.f32 %v1099_v48, %v681_v26  ;;  %v608_v31 = vmul.f32 %v1101_v35, %v1570_v57  ;;  %v474_v32 = vpop.xlane.xlu2 %473  ;;  %vm614_vm12 = vweird.f32 %v1101_v35 }
 0x173   : > { %v418_v33 = vpop.xlane.xlu0 %417  ;;  %v648_v37 = vmul.f32 %v1103_v27, %v1572_v2  ;;  %v1594_v45 = vadd.f32 1e-05, %v558_v38  ;;  %v511_v56 = vmul.f32 0.0078125, %v474_v32  ;;  %vm654_vm13 = vweird.f32 %v1103_v27  ;;  %vm615_vm15 = vmor %vm613_vm14, %vm614_vm12 }
 0x174   : > { %v686_v39 = vsel %vm685_vm11, %v1099_v48, %v682_v29  ;;  %v609_v23 = vmul.f32 %v1101_v35, %v608_v31  ;;  %v1592_v41 = vmul.f32 0.0078125, %v418_v33  ;;  %v426_v42 = vpop.xlane.xlu1 %425  ;;  %vm655_vm1 = vmor %vm653_vm0, %vm654_vm13 }
 0x175   : > { %v765_v28 = vmul.f32 %v686_v39, %v573_v34  ;;  %v649_v43 = vmul.f32 %v1103_v27, %v648_v37  ;;  %v1596_v49 = vmul.f32 0.0078125, %v426_v42  ;;  %1104 = vrsqrt.f32 %v1594_v45 }
 0x176   : > { %v610_v53 = vmul.f32 0.5, %v609_v23  ;;  %v523_v55 = vmul.f32 %v1592_v41, %v1592_v41  ;;  %vm693_vm3 = vweird.f32 %v1594_v45 }
 0x177   : > { %v785_v58 = vmul.f32 %v1542_v16, %v765_v28  ;;  %v650_v59 = vmul.f32 0.5, %v649_v43  ;;  %v527_v1 = vmul.f32 %v1596_v49, %v1596_v49 }
 0x178   : > { %v611_v62 = vsub.f32 1.5, %v610_v53  ;;  %v539_v63 = vsub.f32 %v507_v44, %v523_v55  ;;  %v530_v44 = vmul.f32 %v1622_v21, %v1622_v21 }
 0x179   : > { %v805_v48 = vadd.f32 %v1549_v24, %v785_v58  ;;  %v651_v30 = vsub.f32 1.5, %v650_v59  ;;  %v543_v13 = vsub.f32 %v511_v56, %v527_v1  ;;  %v574_v58 = vsub.f32 %v1465_v54, %v1580_v18 }
 0x17a   : > { %v612_v4 = vmul.f32 %v1101_v35, %v611_v62  ;;  %v555_v46 = vmax.f32 %v539_v63, 0.0  ;;  %v468_v6 = vpop.xlane.xlu2 %467  ;;  %v571_v59 = vsub.f32 %v1474_v60, %v1592_v41 }
 0x17b   : > { %v458_v8 = vpop.xlane.xlu0 %457  ;;  %v821_v12 = vmax.f32 %v805_v48, 0.0  ;;  %v652_v14 = vmul.f32 %v1103_v27, %v651_v30  ;;  %v559_v25 = vmax.f32 %v543_v13, 0.0  ;;  %v1105_v26 = vpop.eup %1104  ;;  %v575_v48 = vsub.f32 %v1482_v0, %v1596_v49 }
 0x17c   : > { %v503_v15 = vmul.f32 0.0078125, %v458_v8  ;;  %v616_v20 = vsel %vm615_vm15, %v1101_v35, %v612_v4  ;;  %v1613_v22 = vadd.f32 1e-05, %v555_v46  ;;  %v412_v57 = vpop.xlane.xlu1 %411  ;;  %v688_v33 = vmul.f32 %v1105_v26, %v1594_v45 }
 0x17d   : > { %837 = vst [vmem:[%s1565_s15 + $0x40] sm:$0xff] %v821_v12  ;;  %v758_v19 = vmul.f32 %v616_v20, %v566_v9  ;;  %v656_v29 = vsel %vm655_vm1, %v1103_v27, %v652_v14  ;;  %v1619_v34 = vadd.f32 1e-05, %v559_v25  ;;  %v1633_v50 = vmul.f32 0.0078125, %v412_v57 }
 0x17e   : > { %v535_v31 = vsub.f32 %v503_v15, %v519_v40  ;;  %v762_v32 = vmul.f32 %v656_v29, %v570_v17  ;;  %1106 = vrsqrt.f32 %v1613_v22  ;;  %v689_v37 = vmul.f32 %v1105_v26, %v688_v33 }
 0x17f   : > { %v778_v2 = vmul.f32 %v1542_v16, %v758_v19  ;;  %1108 = vrsqrt.f32 %v1619_v34  ;;  %vm694_vm2 = vweird.f32 %v1105_v26  ;;  %vm663_vm5 = vweird.f32 %v1613_v22 }
 0x180   : > { %v551_v51 = vmax.f32 %v535_v31, 0.0  ;;  %v782_v35 = vmul.f32 %v1542_v16, %v762_v32  ;;  %v690_v23 = vmul.f32 0.5, %v689_v37  ;;  %vm695_vm4 = vmor %vm693_vm3, %vm694_vm2  ;;  %v508_v54 = vmul.f32 0.0078125, %v468_v6 }
 0x181   : > { %v798_v38 = vadd.f32 %v1549_v24, %v778_v2  ;;  %v520_v60 = vmul.f32 %v1633_v50, %v1633_v50  ;;  %vm703_vm6 = vweird.f32 %v1619_v34 }
 0x182   : > { %v1627_v27 = vadd.f32 1e-05, %v551_v51  ;;  %v802_v39 = vadd.f32 %v1549_v24, %v782_v35  ;;  %v428_v42 = vpop.xlane.xlu2 %427  ;;  %v691_v55 = vsub.f32 1.5, %v690_v23 }
 0x183   : > { %v1630_v28 = vpop.xlane.xlu0 %435  ;;  %v814_v43 = vmax.f32 %v798_v38, 0.0  ;;  %v1643_v63 = vmul.f32 0.0078125, %v428_v42 }
 0x184   : > { %1110 = vrsqrt.f32 %v1627_v27  ;;  %v1107_v53 = vpop.eup %1106  ;;  %v818_v56 = vmax.f32 %v802_v39, 0.0  ;;  %v420_v9 = vpop.xlane.xlu1 %419  ;;  %v692_v1 = vmul.f32 %v1105_v26, %v691_v55  ;;  %vm623_vm12 = vweird.f32 %v1627_v27 }
 0x185   : > { %830 = vst [vmem:[%s1565_s15 + $0x8] sm:$0xff] %v814_v43  ;;  %v658_v62 = vmul.f32 %v1107_v53, %v1613_v22  ;;  %v1649_v40 = vmul.f32 0.0078125, %v420_v9  ;;  %v1109_v30 = vpop.eup %1108  ;;  %vm664_vm7 = vweird.f32 %v1107_v53  ;;  %v528_v13 = vmul.f32 %v1643_v63, %v1643_v63 }
 0x186   : > { %834 = vst [vmem:[%s1565_s15 + $0x28] sm:$0xff] %v818_v56  ;;  %v696_v18 = vsel %vm695_vm4, %v1105_v26, %v692_v1  ;;  %v698_v41 = vmul.f32 %v1109_v30, %v1619_v34  ;;  %vm704_vm8 = vweird.f32 %v1109_v30  ;;  %vm665_vm10 = vmor %vm663_vm5, %vm664_vm7  ;;  %v1685_v34 = vmul.f32 0.0078125, %v1574_v5 }
 0x187   : > { %v659_v4 = vmul.f32 %v1107_v53, %v658_v62  ;;  %v524_v45 = vmul.f32 %v1649_v40, %v1649_v40  ;;  %v766_v49 = vmul.f32 %v696_v18, %v574_v58  ;;  %vm705_vm11 = vmor %vm703_vm6, %vm704_vm8  ;;  %v567_v18 = vsub.f32 %v1460_v52, %v1590_v36 }
 0x188   : > { %v699_v8 = vmul.f32 %v1109_v30, %v698_v41 }
 0x189   : > { %v660_v46 = vmul.f32 0.5, %v659_v4  ;;  %v540_v12 = vsub.f32 %v508_v54, %v524_v45  ;;  %v786_v17 = vmul.f32 %v1542_v16, %v766_v49  ;;  %v1680_v4 = vmul.f32 0.0078125, %v1630_v28 }
 0x18a   : > { %v1111_v0 = vpop.eup %1110  ;;  %v480_v14 = vpop.xlane.xlu2 %479  ;;  %v700_v26 = vmul.f32 0.5, %v699_v8 }
 0x18b   : > { %v618_v6 = vmul.f32 %v1111_v0, %v1627_v27  ;;  %v476_v15 = vpop.xlane.xlu0 %475  ;;  %v661_v20 = vsub.f32 1.5, %v660_v46  ;;  %v514_v25 = vmul.f32 0.0078125, %v480_v14  ;;  %vm624_vm9 = vweird.f32 %v1111_v0 }
 0x18c   : > { %v512_v57 = vmul.f32 0.0078125, %v476_v15  ;;  %v556_v29 = vmax.f32 %v540_v12, 0.0  ;;  %v460_v31 = vpop.xlane.xlu1 %459  ;;  %v806_v32 = vadd.f32 %v1549_v24, %v786_v17  ;;  %v701_v35 = vsub.f32 1.5, %v700_v26  ;;  %vm625_vm13 = vmor %vm623_vm12, %vm624_vm9 }
 0x18d   : > { %v619_v19 = vmul.f32 %v1111_v0, %v618_v6  ;;  %v662_v33 = vmul.f32 %v1107_v53, %v661_v20  ;;  %v546_v2 = vsub.f32 %v514_v25, %v530_v44  ;;  %v504_v39 = vmul.f32 0.0078125, %v460_v31 }
 0x18e   : > { %v544_v51 = vsub.f32 %v512_v57, %v528_v13  ;;  %v1666_v38 = vadd.f32 1e-05, %v556_v29  ;;  %v822_v23 = vmax.f32 %v806_v32, 0.0  ;;  %v702_v9 = vmul.f32 %v1109_v30, %v701_v35 }
 0x18f   : > { %v620_v37 = vmul.f32 0.5, %v619_v19  ;;  %v666_v42 = vsel %vm665_vm10, %v1107_v53, %v662_v33  ;;  %v562_v43 = vmax.f32 %v546_v2, 0.0  ;;  %v536_v62 = vsub.f32 %v504_v39, %v520_v60 }
 0x190   : > { %v560_v56 = vmax.f32 %v544_v51, 0.0  ;;  %v763_v55 = vmul.f32 %v666_v42, %v571_v59  ;;  %1112 = vrsqrt.f32 %v1666_v38  ;;  %838 = vst [vmem:[%s1565_s15 + $0x48] sm:$0xff] %v822_v23  ;;  %v706_v1 = vsel %vm705_vm11, %v1109_v30, %v702_v9 }
 0x191   : > { %v621_v58 = vsub.f32 1.5, %v620_v37  ;;  %v1674_v22 = vadd.f32 1e-05, %v562_v43  ;;  %v767_v27 = vmul.f32 %v706_v1, %v575_v48  ;;  %v552_v28 = vmax.f32 %v536_v62, 0.0 }
 0x192   : > { %v1676_v44 = vadd.f32 1e-05, %v560_v56  ;;  %v783_v53 = vmul.f32 %v1542_v16, %v763_v55  ;;  %v531_v48 = vmul.f32 %v1685_v34, %v1685_v34  ;;  %v532_v13 = vmul.f32 %v1680_v4, %v1680_v4 }
 0x193   : > { %v622_v59 = vmul.f32 %v1111_v0, %v621_v58  ;;  %v482_v54 = vpop.xlane.xlu0 %481  ;;  %1114 = vrsqrt.f32 %v1674_v22  ;;  %v787_v45 = vmul.f32 %v1542_v16, %v767_v27  ;;  %v1696_v8 = vadd.f32 1e-05, %v552_v28 }
 0x194   : > { %v803_v60 = vadd.f32 %v1549_v24, %v783_v53  ;;  %1116 = vrsqrt.f32 %v1676_v44  ;;  %v484_v30 = vpop.xlane.xlu1 %483  ;;  %v515_v52 = vmul.f32 0.0078125, %v482_v54  ;;  %vm673_vm15 = vweird.f32 %v1666_v38 }
 0x195   : > { %v626_v41 = vsel %vm625_vm13, %v1111_v0, %v622_v59  ;;  %v516_v36 = vmul.f32 0.0078125, %v484_v30  ;;  %v807_v0 = vadd.f32 %v1549_v24, %v787_v45  ;;  %1118 = vrsqrt.f32 %v1696_v8 }
 0x196   : > { %v759_v49 = vmul.f32 %v626_v41, %v567_v18  ;;  %v1113_v5 = vpop.eup %1112  ;;  %v819_v46 = vmax.f32 %v803_v60, 0.0  ;;  %v547_v14 = vsub.f32 %v515_v52, %v531_v48  ;;  %v572_v58 = vsub.f32 %v1490_v3, %v1649_v40 }
 0x197   : > { %v668_v12 = vmul.f32 %v1113_v5, %v1666_v38  ;;  %v548_v15 = vsub.f32 %v516_v36, %v532_v13  ;;  %v823_v20 = vmax.f32 %v807_v0, 0.0  ;;  %vm674_vm14 = vweird.f32 %v1113_v5 }
 0x198   : > { %v779_v6 = vmul.f32 %v1542_v16, %v759_v49  ;;  %835 = vst [vmem:[%s1565_s15 + $0x30] sm:$0xff] %v819_v46  ;;  %v563_v29 = vmax.f32 %v547_v14, 0.0  ;;  %vm675_vm0 = vmor %vm673_vm15, %vm674_vm14  ;;  %vm733_vm3 = vweird.f32 %v1674_v22  ;;  %v578_v38 = vsub.f32 %v1449_v47, %v1622_v21 }
 0x199   : > { %v1115_v17 = vpop.eup %1114  ;;  %v669_v57 = vmul.f32 %v1113_v5, %v668_v12  ;;  %v564_v31 = vmax.f32 %v548_v15, 0.0  ;;  %839 = vst [vmem:[%s1565_s15 + $0x50] sm:$0xff] %v823_v20  ;;  %vm713_vm5 = vweird.f32 %v1676_v44  ;;  %v576_v60 = vsub.f32 %v1502_v10, %v1643_v63 }
 0x19a   : > { %v799_v25 = vadd.f32 %v1549_v24, %v779_v6  ;;  %v1117_v26 = vpop.eup %1116  ;;  %v728_v19 = vmul.f32 %v1115_v17, %v1674_v22  ;;  %v1707_v35 = vadd.f32 1e-05, %v563_v29  ;;  %vm734_vm1 = vweird.f32 %v1115_v17 }
 0x19b   : > { %v670_v33 = vmul.f32 0.5, %v669_v57  ;;  %v708_v2 = vmul.f32 %v1117_v26, %v1676_v44  ;;  %v1709_v37 = vadd.f32 1e-05, %v564_v31  ;;  %v1119_v42 = vpop.eup %1118  ;;  %vm714_vm2 = vweird.f32 %v1117_v26  ;;  %vm735_vm4 = vmor %vm733_vm3, %vm734_vm1 }
 0x19c   : > { %v815_v32 = vmax.f32 %v799_v25, 0.0  ;;  %v729_v51 = vmul.f32 %v1115_v17, %v728_v19  ;;  %1120 = vrsqrt.f32 %v1707_v35  ;;  %v628_v9 = vmul.f32 %v1119_v42, %v1696_v8  ;;  %vm715_vm6 = vmor %vm713_vm5, %vm714_vm2 }
 0x19d   : > { %v671_v39 = vsub.f32 1.5, %v670_v33  ;;  %v709_v23 = vmul.f32 %v1117_v26, %v708_v2  ;;  %1122 = vrsqrt.f32 %v1709_v37  ;;  %vm634_vm7 = vweird.f32 %v1119_v42 }
 0x19e   : > { %831 = vst [vmem:[%s1565_s15 + $0x10] sm:$0xff] %v815_v32  ;;  %v730_v43 = vmul.f32 0.5, %v729_v51  ;;  %v629_v59 = vmul.f32 %v1119_v42, %v628_v9  ;;  %vm633_vm8 = vweird.f32 %v1696_v8  ;;  %vm743_vm11 = vweird.f32 %v1707_v35 }
 0x19f   : > { %v672_v56 = vmul.f32 %v1113_v5, %v671_v39  ;;  %v710_v55 = vmul.f32 0.5, %v709_v23  ;;  %vm635_vm9 = vmor %vm633_vm8, %vm634_vm7  ;;  %vm753_vm14 = vweird.f32 %v1709_v37  ;;  %v580_v32 = vsub.f32 %v1505_v11, %v1680_v4 }
 0x1a0   : > { %v731_v62 = vsub.f32 1.5, %v730_v43  ;;  %v630_v3 = vmul.f32 0.5, %v629_v59 }
 0x1a1   : > { %v676_v53 = vsel %vm675_vm0, %v1113_v5, %v672_v56  ;;  %v711_v1 = vsub.f32 1.5, %v710_v55  ;;  %v568_v5 = vsub.f32 %v1498_v7, %v1633_v50 }
 0x1a2   : > { %v764_v54 = vmul.f32 %v676_v53, %v572_v58  ;;  %v732_v18 = vmul.f32 %v1115_v17, %v731_v62  ;;  %v1121_v40 = vpop.eup %1120  ;;  %v631_v22 = vsub.f32 1.5, %v630_v3 }
 0x1a3   : > { %v712_v27 = vmul.f32 %v1117_v26, %v711_v1  ;;  %v738_v49 = vmul.f32 %v1121_v40, %v1707_v35  ;;  %v1123_v47 = vpop.eup %1122  ;;  %vm744_vm10 = vweird.f32 %v1121_v40 }
 0x1a4   : > { %v784_v41 = vmul.f32 %v1542_v16, %v764_v54  ;;  %v736_v28 = vsel %vm735_vm4, %v1115_v17, %v732_v18  ;;  %v632_v10 = vmul.f32 %v1119_v42, %v631_v22  ;;  %v748_v36 = vmul.f32 %v1123_v47, %v1709_v37  ;;  %vm745_vm13 = vmor %vm743_vm11, %vm744_vm10 }
 0x1a5   : > { %v770_v30 = vmul.f32 %v736_v28, %v578_v38  ;;  %v716_v45 = vsel %vm715_vm6, %v1117_v26, %v712_v27  ;;  %v739_v63 = vmul.f32 %v1121_v40, %v738_v49  ;;  %vm754_vm12 = vweird.f32 %v1123_v47 }
 0x1a6   : > { %v804_v21 = vadd.f32 %v1549_v24, %v784_v41  ;;  %v768_v44 = vmul.f32 %v716_v45, %v576_v60  ;;  %v636_v0 = vsel %vm635_vm9, %v1119_v42, %v632_v10  ;;  %v749_v8 = vmul.f32 %v1123_v47, %v748_v36  ;;  %vm755_vm15 = vmor %vm753_vm14, %vm754_vm12 }
 0x1a7   : > { %v790_v52 = vmul.f32 %v1542_v16, %v770_v30  ;;  %v740_v6 = vmul.f32 0.5, %v739_v63  ;;  %v760_v14 = vmul.f32 %v636_v0, %v568_v5  ;;  %v579_v26 = vsub.f32 %v1477_v61, %v1685_v34 }
 0x1a8   : > { %v820_v48 = vmax.f32 %v804_v21, 0.0  ;;  %v788_v46 = vmul.f32 %v1542_v16, %v768_v44  ;;  %v750_v7 = vmul.f32 0.5, %v749_v8 }
 0x1a9   : > { %v810_v13 = vadd.f32 %v1549_v24, %v790_v52  ;;  %v741_v17 = vsub.f32 1.5, %v740_v6  ;;  %v780_v20 = vmul.f32 %v1542_v16, %v760_v14 }
 0x1aa   : > { %836 = vst [vmem:[%s1565_s15 + $0x38] sm:$0xff] %v820_v48  ;;  %v808_v12 = vadd.f32 %v1549_v24, %v788_v46  ;;  %v751_v57 = vsub.f32 1.5, %v750_v7 }
 0x1ab   : > { %v826_v15 = vmax.f32 %v810_v13, 0.0  ;;  %v742_v25 = vmul.f32 %v1121_v40, %v741_v17  ;;  %v800_v19 = vadd.f32 %v1549_v24, %v780_v20 }
 0x1ac   : > { %v824_v50 = vmax.f32 %v808_v12, 0.0  ;;  %v752_v31 = vmul.f32 %v1123_v47, %v751_v57 }
 0x1ad   : > { %842 = vst [vmem:[%s1565_s15 + $0x68] sm:$0xff] %v826_v15  ;;  %v746_v29 = vsel %vm745_vm13, %v1121_v40, %v742_v25  ;;  %v816_v33 = vmax.f32 %v800_v19, 0.0 }
 0x1ae   : > { %840 = vst [vmem:[%s1565_s15 + $0x58] sm:$0xff] %v824_v50  ;;  %v771_v2 = vmul.f32 %v746_v29, %v579_v26  ;;  %v756_v51 = vsel %vm755_vm15, %v1123_v47, %v752_v31 }
 0x1af   : > { %832 = vst [vmem:[%s1565_s15 + $0x18] sm:$0xff] %v816_v33  ;;  %v772_v34 = vmul.f32 %v756_v51, %v580_v32 }
 0x1b0   : > { %v791_v61 = vmul.f32 %v1542_v16, %v771_v2 }
 0x1b1   : > { %v792_v11 = vmul.f32 %v1542_v16, %v772_v34 }
 0x1b2   : > { %v811_v35 = vadd.f32 %v1549_v24, %v791_v61 }
 0x1b3   : > { %v812_v37 = vadd.f32 %v1549_v24, %v792_v11 }
 0x1b4   : > { %v827_v4 = vmax.f32 %v811_v35, 0.0 }
 0x1b5   : > { %v828_v39 = vmax.f32 %v812_v37, 0.0 }
 0x1b6   : > { %843 = vst [vmem:[%s1565_s15 + $0x70] sm:$0xff] %v827_v4 }
 0x1b7   : > { %844 = vst [vmem:[%s1565_s15 + $0x78] sm:$0xff] %v828_v39 }
 0x1b8   : > { %1211 = shalt.err (!%p1208_p10)
}
 0x1b9   : > { %s1261_s28 = smov 128   ;;  %s1262_s8 = smov 8  }
 0x1ba   : > { %1032 = dma.vmem_to_hbm [thread:$0]  (%p1359_p5), %s859_s22, 2048, %s861_s26, %s846_s9, %s1261_s28, %s1261_s28, %s1262_s8  }
 0x1bb PF: > { %p1049_p11 = scmp.ge.s32.totalorder %s1254_s21, 2  ;;  %s875_s15 = sand.u32 1, %s1242_s18  }
 0x1bc   : > { %s876_s16 = scalar_lea.sflag [#allocation4], %s875_s15 }
 0x1bd   : > { %p1043_p12 = pnand %p1049_p11, %p1328_p6 }
 0x1bf   : > { %p1044_p13 = pneg %p1043_p12 }
 0x1c1   : > { %1237 = dma.done.wait (%p1044_p13), %s876_s16, 2048  }
 0x1c2   : > { %1239 = vsyncadd (%p1044_p13), %s876_s16, 4294965248  ;;  %p19_p0 = scmp.ge.s32.totalorder %s1345_s7, 6   ;;  %s1798_s18 = smov %s1246_s19 }
 0x1c3   : > { %s1799_s19 = smov %s1250_s20  ;;  %s1800_s20 = smov %s1355_s12 }
 0x1c4   : > { %s1801_s21 = smov %s1345_s7  ;;  %21 = sbr.rel (!%p19_p0) target bundleno = 6 (0x6), region = 89 }
 0x1c9   :  { %882 = vsyncpa [#allocation3], 1 }
 0x1ca   :  { %884 = vsyncpa [#allocation3 + $0x1], 1 }
 0x1cb   :  { %885 = vsyncpa [#allocation6], 1 }
 0x1cc   :  { %886 = vsyncpa [#allocation4], 1 }
 0x1cd   :  { %888 = vsyncpa [#allocation4 + $0x1], 1 }

</bundles_post_ra>
